<compile_context>
chip_gen: v5e
topology: v5e:2x2
jax: 0.10.0
libtpu: 0.0.40
codegen_flags: <defaults>
</compile_context>

<pallas_src>
import functools
import math

import jax
import jax.numpy as jnp
from jax.experimental import pallas as pl
from jax.experimental.pallas import tpu as pltpu

_NEG_INF = -1e30  # finite "minus infinity" avoids inf-inf NaN corner cases


def _round_up(x, m):
    return ((x + m - 1) // m) * m


def _cdiv(a, b):
    return (a + b - 1) // b


# --------------------------------------------------------------------------
# Fused Linear (x @ W + b), tiled over rows and output columns (weight streamed).
# --------------------------------------------------------------------------
def _linear_kernel(x_ref, w_ref, b_ref, o_ref):
    acc = jnp.dot(x_ref[...], w_ref[...], preferred_element_type=jnp.float32)
    o_ref[...] = (acc + b_ref[...]).astype(o_ref.dtype)


def linear_forward(x2, w, b, *, use_bf16_matmul=True, out_dtype=jnp.float32):
    """x2: (M, K); w: (K, N) (PyTorch weight.T); b: (N,). Returns (M, N) out_dtype."""
    M, K = x2.shape
    Kw, N = w.shape
    assert K == Kw

    in_dtype = jnp.bfloat16 if use_bf16_matmul else jnp.float32
    itm = 2 if use_bf16_matmul else 4
    otm = jnp.dtype(out_dtype).itemsize

    # Row tiles: <=512 rows each, multiple of 8, minimal padding.
    n_m = max(1, _cdiv(M, 512))
    tm = _round_up(_cdiv(M, n_m), 8)
    M_pad = n_m * tm
    if M_pad != M:
        x2 = jnp.pad(x2, ((0, M_pad - M), (0, 0)))

    # Column tiles: stream the weight instead of holding (K, N) resident.
    tn = N
    for cand in (512, 384, 256, 128):
        if N % cand == 0:
            tn = cand
            break
    n_n = N // tn

    xk = x2.astype(in_dtype)
    wk = w.astype(in_dtype)
    b2 = b.reshape(1, N).astype(jnp.float32)  # bias added in f32 after the dot

    # Double-buffered x / w / bias / out tiles.
    vmem_needed = 2 * (tm * K * itm + K * tn * itm + tn * 4 + tm * tn * otm)
    vmem_limit = int(min(48 << 20, max(24 << 20, 2 * vmem_needed)))

    cost = pl.CostEstimate(
        flops=2 * M_pad * K * N,
        transcendentals=0,
        bytes_accessed=int(n_n * M_pad * K * itm + K * N * itm + N * 4 + M_pad * N * otm),
    )

    out = pl.pallas_call(
        _linear_kernel,
        out_shape=jax.ShapeDtypeStruct((M_pad, N), out_dtype),
        grid_spec=pltpu.PrefetchScalarGridSpec(
            num_scalar_prefetch=0,
            # N outer, M inner: the weight tile index is constant along the inner
            # axis -> fetched once per column block; x re-streams n_n times.
            grid=(n_n, n_m),
            in_specs=[
                pl.BlockSpec((tm, K), lambda jn, im: (im, 0)),   # activations
                pl.BlockSpec((K, tn), lambda jn, im: (0, jn)),   # weight column block
                pl.BlockSpec((1, tn), lambda jn, im: (0, jn)),   # bias
            ],
            out_specs=pl.BlockSpec((tm, tn), lambda jn, im: (im, jn)),
        ),
        compiler_params=pltpu.CompilerParams(
            dimension_semantics=("parallel", "parallel"),
            vmem_limit_bytes=vmem_limit),
        cost_estimate=cost,
    )(xk, wk, b2)

    return out[:M] if M_pad != M else out


# --------------------------------------------------------------------------
# Causal flash attention, reading q/k/v straight from the fused (B,T,3C) buffer.
# --------------------------------------------------------------------------
def _attn_kernel(q_ref, k_ref, v_ref, o_ref, m_sc, l_sc, acc_sc, *,
                 scale, tq, tk, g, hd, t_actual, t_padded, approx_recip):
    i = pl.program_id(2)          # q block
    j = pl.program_id(3)          # kv block (reduction axis)
    nk = pl.num_programs(3)

    @pl.when(j == 0)
    def _init():
        m_sc[...] = jnp.full_like(m_sc, _NEG_INF)
        l_sc[...] = jnp.zeros_like(l_sc)
        acc_sc[...] = jnp.zeros_like(acc_sc)

    compute = j * tk <= i * tq + (tq - 1)            # causal block skip
    needs_mask = (j * tk + tk - 1) > (i * tq)        # block touches the diagonal
    if t_padded != t_actual:
        needs_mask = needs_mask | (j == nk - 1)      # padded-tail keys

    def _update(apply_mask):
        q = q_ref[0]   # (tq, g*hd)
        k = k_ref[0]   # (tk, g*hd)
        v = v_ref[0]   # (tk, g*hd)
        if apply_mask:
            q_idx = i * tq + jax.lax.broadcasted_iota(jnp.int32, (tq, tk), 0)
            k_idx = j * tk + jax.lax.broadcasted_iota(jnp.int32, (tq, tk), 1)
            valid = (k_idx <= q_idx) & (k_idx < t_actual)
        for h in range(g):                           # static loop over packed heads
            sl = slice(h * hd, (h + 1) * hd)
            q_h = q[:, sl] * scale                   # fold 1/sqrt(hd) into small q tile
            s = jax.lax.dot_general(q_h, k[:, sl], (((1,), (1,)), ((), ())),
                                    preferred_element_type=jnp.float32)
            if apply_mask:
                s = jnp.where(valid, s, _NEG_INF)
            m_prev = m_sc[h]                                      # (tq, 1)
            m_new = jnp.maximum(m_prev, s.max(axis=-1, keepdims=True))
            alpha = jnp.exp(m_prev - m_new)
            p = jnp.exp(s - m_new)
            l_sc[h] = alpha * l_sc[h] + p.sum(axis=-1, keepdims=True)
            acc_sc[h] = alpha * acc_sc[h] + jnp.dot(
                p.astype(v.dtype), v[:, sl], preferred_element_type=jnp.float32)
            m_sc[h] = m_new

    # Interior below-diagonal blocks skip the iota/compare/select entirely.
    pl.when(compute & needs_mask)(lambda: _update(True))
    pl.when(compute & jnp.logical_not(needs_mask))(lambda: _update(False))

    @pl.when(j == nk - 1)
    def _finalize():
        parts = []
        for h in range(g):
            if approx_recip:
                parts.append(acc_sc[h] * pl.reciprocal(l_sc[h], approx=True))
            else:
                parts.append(acc_sc[h] / l_sc[h])
        y = parts[0] if g == 1 else jnp.concatenate(parts, axis=-1)
        o_ref[0] = y.astype(o_ref.dtype)


def causal_attention_fused(qkv, n_head, hd, t_actual, *, use_bf16_matmul=True):
    """qkv: (B, T, 3C), C = n_head*hd, columns ordered [q heads | k heads | v heads].
    Returns the head-merged attention output y: (B, T, C)."""
    B, T, C3 = qkv.shape
    C = n_head * hd
    assert C3 == 3 * C and T == t_actual

    # Head packing: g heads per program so the block lane width g*hd is a
    # multiple of 128 (lane-dense, full MXU width even when hd < 128).
    g = 128 // math.gcd(hd, 128)
    if n_head % g != 0:
        raise NotImplementedError(
            "n_head must be divisible by the head-packing factor "
            f"(n_head={n_head}, factor={g})")
    ghd = g * hd
    num_hg = n_head // g

    blk = min(256, _round_up(T, 8))     # tq = tk; sweep 256-512 on large T
    T_pad = _round_up(T, blk)
    if T_pad != T:
        qkv = jnp.pad(qkv, ((0, 0), (0, T_pad - T), (0, 0)))
    nq = nk = T_pad // blk

    compute_dtype = jnp.bfloat16 if use_bf16_matmul else jnp.float32
    itm = 2 if use_bf16_matmul else 4
    qkv = qkv.astype(compute_dtype)

    kernel = functools.partial(
        _attn_kernel, scale=1.0 / math.sqrt(hd), tq=blk, tk=blk, g=g, hd=hd,
        t_actual=T, t_padded=T_pad, approx_recip=use_bf16_matmul)

    # Column-block indices inside the (B, T_pad, 3C) buffer (units of g*hd).
    def q_map(b, h, i, j):
        return (b, i, h)

    def k_map(b, h, i, j):
        # Clamp: causally-skipped kv blocks re-use the diagonal block -> no DMA.
        return (b, jnp.minimum(j, i), num_hg + h)

    def v_map(b, h, i, j):
        return (b, jnp.minimum(j, i), 2 * num_hg + h)

    def o_map(b, h, i, j):
        return (b, i, h)

    vmem_needed = (2 * 4 * blk * ghd * itm              # q/k/v/out double-buffered
                   + g * blk * hd * 4 + 2 * g * blk * 4)  # acc, m, l scratch
    vmem_limit = int(min(48 << 20, max(24 << 20, 2 * vmem_needed)))

    bh = B * n_head
    cost = pl.CostEstimate(
        flops=int(2.2 * bh * T_pad * T_pad * hd),        # ~lower-triangular QK^T + PV
        transcendentals=int(0.55 * bh * T_pad * T_pad),
        bytes_accessed=int(B * T_pad * 3 * C * itm * (nq + 1) // 2
                           + B * T_pad * C * itm),
    )

    y = pl.pallas_call(
        kernel,
        out_shape=jax.ShapeDtypeStruct((B, T_pad, C), compute_dtype),
        grid_spec=pltpu.PrefetchScalarGridSpec(
            num_scalar_prefetch=0,
            grid=(B, num_hg, nq, nk),
            in_specs=[
                pl.BlockSpec((1, blk, ghd), q_map),
                pl.BlockSpec((1, blk, ghd), k_map),
                pl.BlockSpec((1, blk, ghd), v_map),
            ],
            out_specs=pl.BlockSpec((1, blk, ghd), o_map),
            scratch_shapes=[
                pltpu.VMEM((g, blk, 1), jnp.float32),    # running max (per head)
                pltpu.VMEM((g, blk, 1), jnp.float32),    # running denom (per head)
                pltpu.VMEM((g, blk, hd), jnp.float32),   # f32 accumulator (per head)
            ]),
        compiler_params=pltpu.CompilerParams(
            dimension_semantics=("parallel", "parallel", "parallel", "arbitrary"),
            vmem_limit_bytes=vmem_limit),
        cost_estimate=cost,
    )(qkv, qkv, qkv)

    return y[:, :T, :] if T_pad != T else y


# --------------------------------------------------------------------------
# Full module forward.
# --------------------------------------------------------------------------
def causal_self_attention_forward(x, w_attn, b_attn, w_proj, b_proj, n_head,
                                  *, use_bf16_matmul=True):
    """Eval-mode CausalSelfAttention.forward (no kv-cache; dropout = identity).

    x: (B, T, C) f32
    w_attn: (C, 3C)  b_attn: (3C,)   -- c_attn weight pre-transposed to (in, out)
    w_proj: (C, C)   b_proj: (C,)    -- c_proj weight pre-transposed to (in, out)
    """
    B, T, C = x.shape
    assert C % n_head == 0
    hd = C // n_head
    M = B * T
    compute_dtype = jnp.bfloat16 if use_bf16_matmul else jnp.float32

    # 1) Fused QKV projection; output kept in the attention compute dtype so the
    #    attention kernel reads it directly (no cast / no head-split transpose).
    qkv = linear_forward(x.reshape(M, C), w_attn, b_attn,
                         use_bf16_matmul=use_bf16_matmul, out_dtype=compute_dtype)
    qkv = qkv.reshape(B, T, 3 * C)   # free reshape; columns already [q | k | v] per head

    # 2) Causal flash attention, writing the head-merged (B,T,C) activation.
    y = causal_attention_fused(qkv, n_head, hd, T, use_bf16_matmul=use_bf16_matmul)

    # 3) Output projection (resid_dropout is identity in eval mode).
    out = linear_forward(y.reshape(M, C), w_proj, b_proj,
                         use_bf16_matmul=use_bf16_matmul, out_dtype=jnp.float32)
    return out.reshape(B, T, C)


# --------------------------------------------------------------------------
# Pure-JAX reference + init.
# --------------------------------------------------------------------------
def attention_reference(x, w_attn, b_attn, w_proj, b_proj, n_head):
    B, T, C = x.shape
    hd = C // n_head
    qkv = x @ w_attn + b_attn
    q, k, v = jnp.split(qkv, 3, axis=-1)

    def heads(t):
        return t.reshape(B, T, n_head, hd).transpose(0, 2, 1, 3)

    q, k, v = heads(q), heads(k), heads(v)
    s = jnp.einsum('bhqd,bhkd->bhqk', q, k) / math.sqrt(hd)
    mask = jnp.tril(jnp.ones((T, T), dtype=bool))
    s = jnp.where(mask, s, -jnp.inf)
    p = jax.nn.softmax(s, axis=-1)
    y = jnp.einsum('bhqk,bhkd->bhqd', p, v)
    y = y.transpose(0, 2, 1, 3).reshape(B, T, C)
    return y @ w_proj + b_proj


def init_params(key, n_embd):
    """nn.Linear default init U(-1/sqrt(in), 1/sqrt(in)); stored as (in, out)."""
    k1, k2, k3, k4 = jax.random.split(key, 4)
    bound = 1.0 / math.sqrt(n_embd)
    w_attn = jax.random.uniform(k1, (n_embd, 3 * n_embd), jnp.float32, -bound, bound)
    b_attn = jax.random.uniform(k2, (3 * n_embd,), jnp.float32, -bound, bound)
    w_proj = jax.random.uniform(k3, (n_embd, n_embd), jnp.float32, -bound, bound)
    b_proj = jax.random.uniform(k4, (n_embd,), jnp.float32, -bound, bound)
    return w_attn, b_attn, w_proj, b_proj


if __name__ == "__main__":
    key = jax.random.PRNGKey(0)
    configs = [
        # (B, T, n_embd, n_head):
        #   hd=128 (g=1), multi-kv-block, padded T  -> exercises block skip + masks
        #   hd=64  (g=2), head packing, padded T    -> exercises packed lanes
        (2, 320, 256, 2),
        (2, 90, 256, 4),
    ]
    for (B, T, C, nh) in configs:
        key, kx, kp = jax.random.split(key, 3)
        x = jax.random.normal(kx, (B, T, C), jnp.float32)
        w_attn, b_attn, w_proj, b_proj = init_params(kp, C)
        ref = attention_reference(x, w_attn, b_attn, w_proj, b_proj, nh)

        # Exact-ish f32 path.
        out_f32 = causal_self_attention_forward(
            x, w_attn, b_attn, w_proj, b_proj, nh, use_bf16_matmul=False)
        out_f32 = jax.block_until_ready(out_f32)
        assert out_f32.shape == (B, T, C)
        assert bool(jnp.allclose(out_f32, ref, atol=2e-4, rtol=2e-4)), "f32 mismatch"

        # Default bf16-MXU / f32-accumulate fast path.
        out_bf16 = causal_self_attention_forward(
            x, w_attn, b_attn, w_proj, b_proj, nh)
        out_bf16 = jax.block_until_ready(out_bf16)
        assert bool(jnp.allclose(out_bf16, ref, atol=7e-2, rtol=7e-2)), "bf16 mismatch"

    print("KERNEL_OK")
</pallas_src>

<mosaic_0001>
module attributes {stable_mosaic.version = 11 : i64} {
  func.func @_linear_kernel(%arg0: i32, %arg1: i32, %arg2: memref<320x256xf32, #tpu.memory_space<vmem>>, %arg3: memref<256x384xf32, #tpu.memory_space<vmem>>, %arg4: memref<1x384xf32, #tpu.memory_space<vmem>>, %arg5: memref<320x384xf32, #tpu.memory_space<vmem>>) attributes {dimension_semantics = [#tpu.dimension_semantics<parallel>, #tpu.dimension_semantics<parallel>], iteration_bounds = array<i64: 2, 2>, scalar_prefetch = 0 : i64, scratch_operands = 0 : i64, tpu.core_type = #tpu.core_type<tc>, window_params = [{transform_indices = @transform_0, window_bounds = array<i64: 320, 256>}, {transform_indices = @transform_1, window_bounds = array<i64: 256, 384>}, {transform_indices = @transform_2, window_bounds = array<i64: 1, 384>}, {transform_indices = @transform_3, window_bounds = array<i64: 320, 384>}]} {
    %c0 = arith.constant 0 : index
    %c0_0 = arith.constant 0 : index
    %0 = vector.load %arg2[%c0, %c0_0] : memref<320x256xf32, #tpu.memory_space<vmem>>, vector<320x256xf32>
    %c0_1 = arith.constant 0 : index
    %c0_2 = arith.constant 0 : index
    %1 = vector.load %arg3[%c0_1, %c0_2] : memref<256x384xf32, #tpu.memory_space<vmem>>, vector<256x384xf32>
    %cst = arith.constant dense<0.000000e+00> : vector<320x384xf32>
    %2 = tpu.matmul %0, %1, %cst {dimension_numbers = #tpu.dot_dimension_numbers<[1], [0], [0], [1], [0, 0, 1, 1], [], []>} : vector<320x256xf32>, vector<256x384xf32>, vector<320x384xf32> -> vector<320x384xf32>
    %c0_3 = arith.constant 0 : index
    %c0_4 = arith.constant 0 : index
    %3 = vector.load %arg4[%c0_3, %c0_4] : memref<1x384xf32, #tpu.memory_space<vmem>>, vector<1x384xf32>
    %4 = vector.broadcast %3 : vector<1x384xf32> to vector<320x384xf32>
    %5 = arith.addf %2, %4 : vector<320x384xf32>
    %c0_5 = arith.constant 0 : index
    %c0_6 = arith.constant 0 : index
    %6 = vector.load %arg5[%c0_5, %c0_6] : memref<320x384xf32, #tpu.memory_space<vmem>>, vector<320x384xf32>
    tpu.vector_store %arg5[%c0_5, %c0_6], %5 {strides = array<i32>} : memref<320x384xf32, #tpu.memory_space<vmem>>, vector<320x384xf32>,
    return
  }
  func.func @transform_0(%arg0: i32, %arg1: i32) -> (i32, i32) {
    %c0_i32 = arith.constant 0 : i32
    %c0_i32_0 = arith.constant 0 : i32
    return %arg1, %c0_i32 : i32, i32
  }
  func.func @transform_1(%arg0: i32, %arg1: i32) -> (i32, i32) {
    %c0_i32 = arith.constant 0 : i32
    %c0_i32_0 = arith.constant 0 : i32
    return %c0_i32, %arg0 : i32, i32
  }
  func.func @transform_2(%arg0: i32, %arg1: i32) -> (i32, i32) {
    %c0_i32 = arith.constant 0 : i32
    %c0_i32_0 = arith.constant 0 : i32
    return %c0_i32, %arg0 : i32, i32
  }
  func.func @transform_3(%arg0: i32, %arg1: i32) -> (i32, i32) {
    %c0_i32 = arith.constant 0 : i32
    return %arg1, %arg0 : i32, i32
  }
}

</mosaic_0001>

<bundles_post_ra>
// kernel: tpu_custom_call.1
= control target key start
LH: loop header
LB: loop body
LE: loop exit
PB: predicated region body
PF: predicated region fallthrough
CT: control target
= control target key end

     0   :  { %s3022_s0 = inlined_call_operand.hbm [shape: f32[640,256], index: 0, kind: input, shape index: {}]   ;;  %s3023_s1 = inlined_call_operand.hbm [shape: f32[256,768], index: 1, kind: input, shape index: {}]   ;;  %s3024_s2 = inlined_call_operand.hbm [shape: f32[1,768], index: 2, kind: input, shape index: {}]   ;;  %s3025_s3 = inlined_call_operand.hbm [shape: f32[640,768], index: 3, kind: output, shape index: {}]  }
   0x1   :  { %3038 = sst [smem:[#allocation25_spill]] %s3023_s1 }
   0x2   :  { %3039 = sst [smem:[#allocation26_spill]] %s3025_s3 }
   0x3   :  { %8 = vsyncpa [#allocation3], 0 }
   0x4   :  { %10 = vsyncpa [#allocation3 + $0x1], 0 }
   0x5   :  { %11 = vsyncpa [#allocation6], 0 }
   0x6   :  { %13 = vsyncpa [#allocation6 + $0x1], 0 }
   0x7   :  { %14 = vsyncpa [#allocation4], 0 }
   0x8   :  { %16 = vsyncpa [#allocation4 + $0x1], 0  ;;  %s2074_s12 = smov 0   ;;  %s2076_s13 = smov 0  }
   0x9   :  { %s2078_s14 = smov 0   ;;  %s2080_s15 = smov 0  }
   0xa   :  { %s2082_s16 = smov 0   ;;  %s2084_s17 = smov 0  }
   0xb   :  { %s2086_s18 = smov 0   ;;  %s2088_s19 = smov 0  }
   0xc   :  { %s2090_s20 = smov 0   ;;  %s2092_s21 = smov 0  }
   0xd   :  { %s2094_s22 = smov 0   ;;  %s2096_s23 = smov 0  }
   0xe   :  { %s2098_s24 = smov 0   ;;  %s2100_s25 = smov 0  }
   0xf LB: > { %3040 = sst [smem:[#allocation12_spill]] %s1992_s12  ;;  %p49_p0 = scmp.eq.s32.totalorder %s2044_s25, 0  ;;  %s2044_s25 = sphi %s2100_s25, %s22_s25   ;;  %s2040_s24 = sphi %s2098_s24, %s3090_s24   ;;  %s2036_s23 = sphi %s2096_s23, %s3089_s23   ;;  %s2032_s22 = sphi %s2094_s22, %s3088_s22   ;;  %s2028_s21 = sphi %s2092_s21, %s3087_s21   ;;  %s2024_s20 = sphi %s2090_s20, %s3076_s20   ;;  %s2020_s19 = sphi %s2088_s19, %s3086_s19   ;;  %s2016_s18 = sphi %s2086_s18, %s3085_s18   ;;  %s2012_s17 = sphi %s2084_s17, %s3084_s17   ;;  %s2008_s16 = sphi %s2082_s16, %s3083_s16   ;;  %s2004_s15 = sphi %s2080_s15, %s3082_s15   ;;  %s2000_s14 = sphi %s2078_s14, %s3073_s14   ;;  %s1996_s13 = sphi %s2076_s13, %s3081_s13   ;;  %s1992_s12 = sphi %s2074_s12, %s3080_s12  }
  0x10   : > { %3041 = sst [smem:[#allocation13_spill]] %s2000_s14  ;;  %p74_p1 = scmp.ne.s32.totalorder %s2012_s17, %s2008_s16 }
  0x11   : > { %3042 = sst [smem:[#allocation14_spill]] %s2024_s20  ;;  %p80_p2 = scmp.ne.s32.totalorder %s2008_s16, %s2004_s15 }
  0x12   : > { %3043 = sst [smem:[#allocation15_spill]] %s2028_s21  ;;  %p3029_p3 = scmp.lt.s32.totalorder %s2044_s25, 4 }
  0x13   : > { %3044 = sst [smem:[#allocation16_spill]] %s2032_s22  ;;  %p76_p4 = por %p74_p1, %p49_p0 }
  0x14   : > { %3045 = sst [smem:[#allocation17_spill]] %s2036_s23  ;;  %s181_s27 = sand.u32 1, %s2044_s25  }
  0x15   : > { %s3026_s28 = sand.u32 1, %s2012_s17   ;;  %p2159_p5 = pnand %p3029_p3, %p76_p4 }
  0x16   : > { %s1612_s29 = smul.u32 768, %s3026_s28  ;;  %s3047_s1 = sld [smem:[#allocation25_spill]] }
  0x17   : > { %s1577_s4 = smul.u32 24, %s2040_s24  ;;  %p1571_p6 = scmp.ge.s32.totalorder %s2044_s25, 1 }
  0x18   : > { %s185_s8 = scalar_lea.vmem [#allocation5], %s1612_s29  ;;  %s2168_s11 = scalar_lea.sflag [#allocation6], %s181_s27 }
  0x19   : > { %s193_s9 = sshll.u32 %s185_s8, 4  ;;  %s2046_s5 = smov 768   ;;  %s194_s9 = int_to_ptr.vmem [resolvable:$true] %s193_s9 }
  0x1a   : > { %s2048_s29 = smov 24   ;;  %p220_p7 = scmp.lt.s32.totalorder %s2044_s25, 5 }
  0x1b   : > { %s1565_s27 = sadd.s32 4294967294, %s2044_s25   ;;  %s31_s8 = sadd.s32 1, %s2036_s23 }
  0x1c   : > { %s190_s7 = scalar_lea.hbm %s3047_s1, %s1577_s4  ;;  %s2047_s4 = smov 384  }
  0x1d   : > { %s191_s10 = sshll.u32 %s190_s7, 4  ;;  %p2174_p8 = pnand %p1571_p6, %p220_p7  ;;  %s192_s10 = int_to_ptr.hbm [resolvable:$true] %s191_s10 }
  0x1e   : > { %1633 = dma.hbm_to_vmem [thread:$0]  (!%p2159_p5), %s192_s10, 12288, %s194_s9, %s2168_s11, %s2046_s5, %s2047_s4, %s2048_s29  }
  0x1f   : > { %s2179_s7 = sadd.s32 4294967295, %s2044_s25   ;;  %s34_s28 = sadd.s32 1, %s2040_s24 }
  0x20   : > { %p32_p9 = scmp.ge.s32.totalorder %s31_s8, 2  ;;  %s41_s26 = sadd.s32 1, %s2024_s20 }
  0x21   : > { %p48_p10 = scmp.ne.s32.totalorder %s2024_s20, %s2020_s19  ;;  %p54_p11 = scmp.ne.s32.totalorder %s2020_s19, %s2016_s18 }
  0x22   : > { %s3092_s8 = smov (%p32_p9, %s31_s8), 0  ;;  %s3094_s28 = smov (!%p32_p9, %s34_s28), %s2040_s24 }
  0x23   : > { %3049 = sst [smem:[#allocation18_spill]] %s3092_s8  ;;  %s38_s9 = ssub.s32 %s2036_s23, %s3092_s8 }
  0x24   : > { %p2196_p12 = por %p49_p0, %p48_p10  ;;  %p36_p13 = scmp.ge.s32.totalorder %s3094_s28, 2 }
  0x25   : > { %p39_p1 = scmp.eq.s32.totalorder %s38_s9, 0  ;;  %p55_p4 = scmp.eq.s32.totalorder %s2179_s7, 0 }
  0x26   : > { %s121_s18 = sadd.s32 1, %s2000_s14  ;;  %s3096_s28 = smov (%p36_p13, %s3094_s28), 0 }
  0x27   : > { %3051 = sst [smem:[#allocation19_spill]] %s3096_s28  ;;  %p2207_p6 = por %p55_p4, %p54_p11 }
  0x28   : > { %s2205_s5 = scalar_select %p39_p1, %s2024_s20, %s41_s26  }
  0x29   : > { %s64_s29 = ssub.s32 %s2040_s24, %s3096_s28  ;;  %p2216_p7 = por %p80_p2, %p55_p4 }
  0x2a   : > { %3052 = sst [smem:[#allocation20_spill]] %s2205_s5  ;;  %p65_p0 = scmp.eq.s32.totalorder %s64_s29, 0 }
  0x2b   : > { %s118_s8 = sor.u32 %s64_s29, %s38_s9  ;;  %p131_p9 = scmp.ne.s32.totalorder %s2000_s14, %s1996_s13 }
  0x2c   : > { %s3055_s3 = sadd.s32 1, %s2012_s17  ;;  %p119_p10 = scmp.eq.s32.totalorder %s118_s8, 0 }
  0x2d   : > { %s2225_s21 = scalar_select %p65_p0, %s2012_s17, %s3055_s3  }
  0x2e   : > { %p132_p13 = scmp.eq.s32.totalorder %s2179_s7, 3  ;;  %p137_p11 = scmp.ne.s32.totalorder %s1996_s13, %s1992_s12 }
  0x2f   : > { %3056 = sst [smem:[#allocation21_spill]] %s2225_s21  ;;  %p138_p1 = scmp.eq.s32.totalorder %s1565_s27, 3 }
  0x30   : > { %s2231_s26 = scalar_select %p119_p10, %s2000_s14, %s121_s18  }
  0x31   : > { %p2233_p3 = por %p132_p13, %p131_p9  ;;  %p2237_p2 = por %p138_p1, %p137_p11 }
  0x32   : > { %3057 = sst [smem:[#allocation22_spill]] %s2231_s26  ;;  %s158_s9 = sand.u32 1, %s2024_s20  }
  0x33   : > { %s3058_s28 = scalar_select %p2233_p3, 1, 0 }
  0x34   : > { %s3060_s15 = scalar_select %p2237_p2, 1, 0 }
  0x35   : > { %3059 = sst [smem:[#allocation23_spill]] %s3058_s28  ;;  %s1578_s29 = smul.u32 640, %s2036_s23 }
  0x36   : > { %3061 = sst [smem:[#allocation24_spill]] %s3060_s15  ;;  %s1611_s3 = smul.u32 640, %s158_s9 }
  0x37   : > { %s168_s21 = scalar_lea.hbm %s3022_s0, %s1578_s29  ;;  %p3062_p4 = scmp.lt.s32.totalorder %s2044_s25, 4 }
  0x38   : > { %s169_s27 = sshll.u32 %s168_s21, 4  ;;  %s162_s18 = scalar_lea.vmem [#allocation2], %s1611_s3  ;;  %s170_s27 = int_to_ptr.hbm [resolvable:$true] %s169_s27 }
  0x39   : > { %p1628_p0 = pnand %p3062_p4, %p2196_p12  ;;  %s171_s26 = sshll.u32 %s162_s18, 4  ;;  %s172_s26 = int_to_ptr.vmem [resolvable:$true] %s171_s26 }
  0x3a   : > { %s159_s14 = scalar_lea.sflag [#allocation3], %s158_s9  ;;  %s2049_s15 = smov 256  }
  0x3b   : > { %s2050_s12 = smov 16   ;;  %s3063_s23 = sand.u32 1, %s2012_s17  }
  0x3c   : > { %1630 = dma.hbm_to_vmem [thread:$0]  (!%p1628_p0), %s170_s27, 10240, %s172_s26, %s159_s14, %s2049_s15, %s2049_s15, %s2050_s12  }
  0x3d   : > { %s1613_s20 = smul.u32 3, %s3063_s23  ;;  %s226_s12 = sand.u32 (!%p2174_p8), 1, %s2020_s19  }
  0x3e   : > { %s208_s28 = smul.u32 3, %s2040_s24  ;;  %s227_s23 = scalar_lea.sflag (!%p2174_p8), [#allocation3], %s226_s12 }
  0x3f   : > { %s207_s29 = scalar_lea.vmem [#allocation7], %s1613_s20  ;;  %224 = sbr.rel (%p2174_p8) target bundleno = 719 (0x2cf), region = 32 }
  0x40   : > { %s211_s10 = scalar_lea.hbm %s3024_s2, %s208_s28  ;;  %s215_s8 = sshll.u32 %s207_s29, 4  ;;  %s216_s8 = int_to_ptr.vmem [resolvable:$true] %s215_s8 }
  0x41   : > { %s213_s21 = sshll.u32 %s211_s10, 4  ;;  %s1614_s14 = smul.u32 (!%p2174_p8), 640, %s226_s12  ;;  %s214_s21 = int_to_ptr.hbm [resolvable:$true] %s213_s21 }
  0x42   : > { %1636 = dma.hbm_to_vmem [thread:$0]  (!%p2159_p5), %s214_s21, 48, %s216_s8, %s2168_s11  }
  0x43   : > { %s2262_s26 = scalar_lea.vmem (!%p2174_p8), [#allocation2], %s1614_s14 }
  0x44   : > { %1979 = dma.done.wait (%p2207_p6), %s227_s23, 10240  }
  0x45   : > { %1981 = vsyncadd (%p2207_p6), %s227_s23, 4294957056  ;;  %s236_s20 = sand.u32 1, %s2179_s7   ;;  %s238_s22 = sand.u32 1, %s2008_s16  }
  0x46   : > { %s1615_s28 = smul.u32 768, %s238_s22  ;;  %s237_s30 = scalar_lea.sflag [#allocation6], %s236_s20 }
  0x48   : > { %s2272_s11 = scalar_lea.vmem [#allocation5], %s1615_s28 }
  0x49   : > { %1983 = dma.done.wait (%p2216_p7), %s237_s30, 12336  }
  0x4a   : > { %1985 = vsyncadd (%p2216_p7), %s237_s30, 4294954960  ;;  %v414_v0 = vld [vmem:[%s2272_s11 + $0x168] sm:$0xff]  ;;  %v411_v1 = vld [vmem:[%s2272_s11 + $0x150] sm:$0xff]  ;;  %s1616_s1 = smul.u32 3, %s238_s22  ;;  %s281_s7 = sand.u32 1, %s1996_s13  }
  0x4b   : > { %v462_v2 = vld [vmem:[%s2272_s11 + $0x2e8] sm:$0xff]  ;;  %1579 = vmatpush.msra.mxu2 %v414_v0  ;;  %v459_v3 = vld [vmem:[%s2272_s11 + $0x2d0] sm:$0xff]  ;;  %v408_v4 = vld [vmem:[%s2272_s11 + $0x138] sm:$0xff]  ;;  %473 = vmatpush.msra.mxu0 %v414_v0  ;;  %s1617_s4 = smul.u32 960, %s281_s7  ;;  %s3064_s9 = sld [smem:[#allocation16_spill]] }
  0x4c   : > { %1595 = vmatpush.msra.mxu3 %v462_v2  ;;  %v456_v5 = vld [vmem:[%s2272_s11 + $0x2b8] sm:$0xff]  ;;  %610 = vmatpush.msra.mxu1 %v462_v2  ;;  %v405_v6 = vld [vmem:[%s2272_s11 + $0x120] sm:$0xff]  ;;  %v402_v8 = vld [vmem:[%s2272_s11 + $0x108] sm:$0xff]  ;;  %s250_s6 = scalar_lea.vmem [#allocation7], %s1616_s1  ;;  %s3065_s3 = sld [smem:[#allocation15_spill]] }
  0x4d   : > { %1580 = vmatpush.msra.mxu2 %v411_v1  ;;  %474 = vmatpush.msra.mxu0 %v411_v1  ;;  %v453_v7 = vld [vmem:[%s2272_s11 + $0x2a0] sm:$0xff]  ;;  %v450_v9 = vld [vmem:[%s2272_s11 + $0x288] sm:$0xff]  ;;  %v399_v10 = vld [vmem:[%s2272_s11 + $0xf0] sm:$0xff]  ;;  %s2556_s15 = scalar_lea.vmem [#allocation8], %s1617_s4  ;;  %s3066_s21 = sld [smem:[#allocation26_spill]] }
  0x4e   : > { %1596 = vmatpush.msra.mxu3 %v459_v3  ;;  %611 = vmatpush.msra.mxu1 %v459_v3  ;;  %v447_v11 = vld [vmem:[%s2272_s11 + $0x270] sm:$0xff]  ;;  %v396_v12 = vld [vmem:[%s2272_s11 + $0xd8] sm:$0xff]  ;;  %v393_v14 = vld [vmem:[%s2272_s11 + $0xc0] sm:$0xff]  ;;  %s1431_s14 = sshll.u32 %s2556_s15, 4  ;;  %s1416_s22 = scalar_lea.sflag [#allocation4], %s281_s7  ;;  %s1432_s14 = int_to_ptr.vmem [resolvable:$true] %s1431_s14 }
  0x4f   : > { %1581 = vmatpush.msra.mxu2 %v408_v4  ;;  %475 = vmatpush.msra.mxu0 %v408_v4  ;;  %v444_v13 = vld [vmem:[%s2272_s11 + $0x258] sm:$0xff]  ;;  %v441_v15 = vld [vmem:[%s2272_s11 + $0x240] sm:$0xff]  ;;  %v390_v16 = vld [vmem:[%s2272_s11 + $0xa8] sm:$0xff] }
  0x50   : > { %1597 = vmatpush.msra.mxu3 %v456_v5  ;;  %612 = vmatpush.msra.mxu1 %v456_v5  ;;  %v438_v17 = vld [vmem:[%s2272_s11 + $0x228] sm:$0xff]  ;;  %v387_v18 = vld [vmem:[%s2272_s11 + $0x90] sm:$0xff]  ;;  %v384_v20 = vld [vmem:[%s2272_s11 + $0x78] sm:$0xff] }
  0x51   : > { %1582 = vmatpush.msra.mxu2 %v405_v6  ;;  %476 = vmatpush.msra.mxu0 %v405_v6  ;;  %v435_v19 = vld [vmem:[%s2272_s11 + $0x210] sm:$0xff]  ;;  %v432_v21 = vld [vmem:[%s2272_s11 + $0x1f8] sm:$0xff]  ;;  %v381_v22 = vld [vmem:[%s2272_s11 + $0x60] sm:$0xff]  ;;  %s1424_s27 = smul.u32 3, %s3064_s9 }
  0x52   : > { %1598 = vmatpush.msra.mxu3 %v453_v7  ;;  %613 = vmatpush.msra.mxu1 %v453_v7  ;;  %v429_v23 = vld [vmem:[%s2272_s11 + $0x1e0] sm:$0xff]  ;;  %v378_v24 = vld [vmem:[%s2272_s11 + $0x48] sm:$0xff]  ;;  %v375_v26 = vld [vmem:[%s2272_s11 + $0x30] sm:$0xff]  ;;  %s1642_s18 = smul.u32 240, %s3065_s3 }
  0x53   : > { %1583 = vmatpush.msra.mxu2 %v402_v8  ;;  %477 = vmatpush.msra.mxu0 %v402_v8  ;;  %v426_v25 = vld [vmem:[%s2272_s11 + $0x1c8] sm:$0xff]  ;;  %v423_v27 = vld [vmem:[%s2272_s11 + $0x1b0] sm:$0xff]  ;;  %v372_v28 = vld [vmem:[%s2272_s11 + $0x18] sm:$0xff] }
  0x54   : > { %1599 = vmatpush.msra.mxu3 %v450_v9  ;;  %614 = vmatpush.msra.mxu1 %v450_v9  ;;  %v420_v29 = vld [vmem:[%s2272_s11 + $0x198] sm:$0xff]  ;;  %v369_v30 = vld [vmem:[%s2272_s11] sm:$0xff]  ;;  %v330_v33 = vld [vmem:[%s2262_s26 + $0x148] sm:$0xff]  ;;  %s1428_s5 = sadd.s32 %s1642_s18, %s1424_s27 }
  0x55   : > { %1584 = vmatpush.msra.mxu2 %v399_v10  ;;  %478 = vmatpush.msra.mxu0 %v399_v10  ;;  %v417_v31 = vld [vmem:[%s2272_s11 + $0x180] sm:$0xff]  ;;  %v415_v34 = vld [vmem:[%s2272_s11 + $0x170] sm:$0xff]  ;;  %v2318_v37 = vld [vmem:[%s2262_s26 + $0x8] sm:$0xff]  ;;  %s1572_s10 = sshll.u32 %s1428_s5, 3 }
  0x56   : > { %1600 = vmatpush.msra.mxu3 %v447_v11  ;;  %615 = vmatpush.msra.mxu1 %v447_v11  ;;  %v329_v32 = vld [vmem:[%s2262_s26 + $0x140] sm:$0xff]  ;;  %v463_v35 = vld [vmem:[%s2272_s11 + $0x2f0] sm:$0xff]  ;;  %v416_v38 = vld [vmem:[%s2272_s11 + $0x178] sm:$0xff]  ;;  %s1430_s12 = scalar_lea.hbm %s3066_s21, %s1572_s10 }
  0x57   : > { %1585 = vmatpush.msra.mxu2 %v396_v12  ;;  %479 = vmatpush.msra.mxu0 %v396_v12  ;;  %v2315_v36 = vld [vmem:[%s2262_s26] sm:$0xff]  ;;  %v464_v39 = vld [vmem:[%s2272_s11 + $0x2f8] sm:$0xff]  ;;  %v331_v46 = vld [vmem:[%s2262_s26 + $0x150] sm:$0xff]  ;;  %s1433_s20 = sshll.u32 %s1430_s12, 4  ;;  %s1434_s20 = int_to_ptr.hbm [resolvable:$true] %s1433_s20 }
  0x58   : > { %1601 = vmatpush.msra.mxu3 %v444_v13  ;;  %616 = vmatpush.msra.mxu1 %v444_v13  ;;  %v412_v40 = vld [vmem:[%s2272_s11 + $0x158] sm:$0xff]  ;;  %v413_v42 = vld [vmem:[%s2272_s11 + $0x160] sm:$0xff]  ;;  %v410_v48 = vld [vmem:[%s2272_s11 + $0x148] sm:$0xff]  ;;  %s1908_s28 = sshra.s32 %s1434_s20, 4  ;;  %s1909_s28 = int_to_ptr.hbm [resolvable:$true] %s1908_s28 }
  0x59   : > { %1586 = vmatpush.msra.mxu2 %v393_v14  ;;  %480 = vmatpush.msra.mxu0 %v393_v14  ;;  %v460_v41 = vld [vmem:[%s2272_s11 + $0x2d8] sm:$0xff]  ;;  %v461_v43 = vld [vmem:[%s2272_s11 + $0x2e0] sm:$0xff]  ;;  %v458_v49 = vld [vmem:[%s2272_s11 + $0x2c8] sm:$0xff]  ;;  %s1910_s30 = scalar_lea.hbm %s1909_s28, 960 }
  0x5a   : > { %1602 = vmatpush.msra.mxu3 %v441_v15  ;;  %617 = vmatpush.msra.mxu1 %v441_v15  ;;  %v409_v44 = vld [vmem:[%s2272_s11 + $0x140] sm:$0xff]  ;;  %v332_v47 = vld [vmem:[%s2262_s26 + $0x158] sm:$0xff]  ;;  %v406_v50 = vld [vmem:[%s2272_s11 + $0x128] sm:$0xff]  ;;  %p1911_p5 = scmp.ne.s32.totalorder %s1909_s28, %s1910_s30 }
  0x5b   : > { %1587 = vmatpush.msra.mxu2 %v390_v16  ;;  %481 = vmatpush.msra.mxu0 %v390_v16  ;;  %v457_v45 = vld [vmem:[%s2272_s11 + $0x2c0] sm:$0xff]  ;;  %v454_v51 = vld [vmem:[%s2272_s11 + $0x2a8] sm:$0xff]  ;;  %v2337_v52 = vld [vmem:[%s2262_s26 + $0x10] sm:$0xff] }
  0x5c   : > { %1603 = vmatpush.msra.mxu3 %v438_v17  ;;  %618 = vmatpush.msra.mxu1 %v438_v17  ;;  %v2340_v53 = vld [vmem:[%s2262_s26 + $0x18] sm:$0xff]  ;;  %v407_v54 = vld [vmem:[%s2272_s11 + $0x130] sm:$0xff]  ;;  %v333_v59 = vld [vmem:[%s2262_s26 + $0x160] sm:$0xff]  ;;  %p1912_p8 = pnand %p1911_p5, %p2233_p3 }
  0x5d   : > { %1588 = vmatpush.msra.mxu2 %v387_v18  ;;  %482 = vmatpush.msra.mxu0 %v387_v18  ;;  %v455_v55 = vld [vmem:[%s2272_s11 + $0x2b0] sm:$0xff]  ;;  %v404_v58 = vld [vmem:[%s2272_s11 + $0x118] sm:$0xff]  ;;  %v334_v60 = vld [vmem:[%s2262_s26 + $0x168] sm:$0xff] }
  0x5e   : > { %1604 = vmatpush.msra.mxu3 %v435_v19  ;;  %619 = vmatpush.msra.mxu1 %v435_v19  ;;  %v403_v56 = vld [vmem:[%s2272_s11 + $0x110] sm:$0xff]  ;;  %v2352_v61 = vld [vmem:[%s2262_s26 + $0x20] sm:$0xff]  ;;  %v2355_v62 = vld [vmem:[%s2262_s26 + $0x28] sm:$0xff]  ;;  %p1913_p12 = pneg %p1912_p8 }
  0x5f   : > { %1589 = vmatpush.msra.mxu2 %v384_v20  ;;  %483 = vmatpush.msra.mxu0 %v384_v20  ;;  %v451_v57 = vld [vmem:[%s2272_s11 + $0x290] sm:$0xff]  ;;  %v452_v63 = vld [vmem:[%s2272_s11 + $0x298] sm:$0xff]  ;;  %v401_v6 = vld [vmem:[%s2272_s11 + $0x100] sm:$0xff] }
  0x60   : > { %1605 = vmatpush.msra.mxu3 %v432_v21  ;;  %620 = vmatpush.msra.mxu1 %v432_v21  ;;  %v400_v0 = vld [vmem:[%s2272_s11 + $0xf8] sm:$0xff]  ;;  %v335_v2 = vld [vmem:[%s2262_s26 + $0x170] sm:$0xff]  ;;  %v449_v7 = vld [vmem:[%s2272_s11 + $0x280] sm:$0xff] }
  0x61   : > { %1590 = vmatpush.msra.mxu2 %v381_v22  ;;  %484 = vmatpush.msra.mxu0 %v381_v22  ;;  %v448_v1 = vld [vmem:[%s2272_s11 + $0x278] sm:$0xff]  ;;  %v2365_v4 = vld [vmem:[%s2262_s26 + $0x30] sm:$0xff]  ;;  %v397_v8 = vld [vmem:[%s2272_s11 + $0xe0] sm:$0xff] }
  0x62   : > { %1606 = vmatpush.msra.mxu3 %v429_v23  ;;  %621 = vmatpush.msra.mxu1 %v429_v23  ;;  %v336_v3 = vld [vmem:[%s2262_s26 + $0x178] sm:$0xff]  ;;  %v445_v9 = vld [vmem:[%s2272_s11 + $0x260] sm:$0xff]  ;;  %v338_v11 = vld [vmem:[%s2262_s26 + $0x188] sm:$0xff] }
  0x63   : > { %1591 = vmatpush.msra.mxu2 %v378_v24  ;;  %485 = vmatpush.msra.mxu0 %v378_v24  ;;  %v2368_v5 = vld [vmem:[%s2262_s26 + $0x38] sm:$0xff]  ;;  %v337_v10 = vld [vmem:[%s2262_s26 + $0x180] sm:$0xff]  ;;  %v2382_v13 = vld [vmem:[%s2262_s26 + $0x48] sm:$0xff] }
  0x64   : > { %1607 = vmatpush.msra.mxu3 %v426_v25  ;;  %622 = vmatpush.msra.mxu1 %v426_v25  ;;  %v2379_v12 = vld [vmem:[%s2262_s26 + $0x40] sm:$0xff]  ;;  %v398_v14 = vld [vmem:[%s2272_s11 + $0xe8] sm:$0xff]  ;;  %v339_v17 = vld [vmem:[%s2262_s26 + $0x190] sm:$0xff] }
  0x65   : > { %1592 = vmatpush.msra.mxu2 %v375_v26  ;;  %486 = vmatpush.msra.mxu0 %v375_v26  ;;  %v446_v15 = vld [vmem:[%s2272_s11 + $0x268] sm:$0xff]  ;;  %v340_v18 = vld [vmem:[%s2262_s26 + $0x198] sm:$0xff]  ;;  %v2392_v19 = vld [vmem:[%s2262_s26 + $0x50] sm:$0xff] }
  0x66   : > { %1608 = vmatpush.msra.mxu3 %v423_v27  ;;  %623 = vmatpush.msra.mxu1 %v423_v27  ;;  %v394_v16 = vld [vmem:[%s2272_s11 + $0xc8] sm:$0xff]  ;;  %v2395_v20 = vld [vmem:[%s2262_s26 + $0x58] sm:$0xff]  ;;  %v395_v22 = vld [vmem:[%s2272_s11 + $0xd0] sm:$0xff] }
  0x67   : > { %1593 = vmatpush.msra.mxu2 %v372_v28  ;;  %487 = vmatpush.msra.mxu0 %v372_v28  ;;  %v442_v21 = vld [vmem:[%s2272_s11 + $0x248] sm:$0xff]  ;;  %v443_v23 = vld [vmem:[%s2272_s11 + $0x250] sm:$0xff]  ;;  %v341_v24 = vld [vmem:[%s2262_s26 + $0x1a0] sm:$0xff] }
  0x68   : > { %1609 = vmatpush.msra.mxu3 %v420_v29  ;;  %624 = vmatpush.msra.mxu1 %v420_v29  ;;  %v342_v25 = vld [vmem:[%s2262_s26 + $0x1a8] sm:$0xff]  ;;  %v2405_v26 = vld [vmem:[%s2262_s26 + $0x60] sm:$0xff]  ;;  %v391_v28 = vld [vmem:[%s2272_s11 + $0xb0] sm:$0xff] }
  0x69   : > { %1594 = vmatpush.msra.mxu2 %v369_v30  ;;  %488 = vmatpush.msra.mxu0 %v369_v30  ;;  %v2408_v27 = vld [vmem:[%s2262_s26 + $0x68] sm:$0xff]  ;;  %v439_v29 = vld [vmem:[%s2272_s11 + $0x230] sm:$0xff]  ;;  %v392_v30 = vld [vmem:[%s2272_s11 + $0xb8] sm:$0xff] }
  0x6a   : > { %1610 = vmatpush.msra.mxu3 %v417_v31  ;;  %549 = vmatmul.f32.vlgmr.msra.gmra.mxu2 %v329_v32  ;;  %v344_v32 = vld [vmem:[%s2262_s26 + $0x1b8] sm:$0xff] }
  0x6b   : > { %686 = vmatmul.f32.vlgmr.msra.gmra.mxu3 %v330_v33  ;;  %747 = vmatpush.msrb.mxu2 %v415_v34  ;;  %v2418_v33 = vld [vmem:[%s2262_s26 + $0x70] sm:$0xff]  ;;  %v2421_v34 = vld [vmem:[%s2262_s26 + $0x78] sm:$0xff] }
  0x6c   : > { %884 = vmatpush.msrb.mxu3 %v463_v35  ;;  %625 = vmatpush.msra.mxu1 %v417_v31  ;;  %v343_v31 = vld [vmem:[%s2262_s26 + $0x1b0] sm:$0xff]  ;;  %v440_v35 = vld [vmem:[%s2272_s11 + $0x238] sm:$0xff] }
  0x6d   : > { %489 = vmatmul.f32.vlgmr.msra.gmra.mxu0 %v2315_v36  ;;  %626 = vmatmul.f32.vlgmr.msra.gmra.mxu1 %v2318_v37 }
  0x6e   : > { %1021 = vmatpush.msrb.mxu0 %v416_v38  ;;  %1158 = vmatpush.msrb.mxu1 %v464_v39  ;;  %v388_v38 = vld [vmem:[%s2272_s11 + $0x98] sm:$0xff] }
  0x6f   : > { %748 = vmatpush.msrb.mxu2 %v412_v40  ;;  %885 = vmatpush.msrb.mxu3 %v460_v41  ;;  %v436_v39 = vld [vmem:[%s2272_s11 + $0x218] sm:$0xff]  ;;  %v345_v40 = vld [vmem:[%s2262_s26 + $0x1c0] sm:$0xff]  ;;  %v346_v41 = vld [vmem:[%s2262_s26 + $0x1c8] sm:$0xff] }
  0x70   : > { %1022 = vmatpush.msrb.mxu0 %v413_v42  ;;  %1159 = vmatpush.msrb.mxu1 %v461_v43  ;;  %v2431_v42 = vld [vmem:[%s2262_s26 + $0x80] sm:$0xff]  ;;  %v2434_v43 = vld [vmem:[%s2262_s26 + $0x88] sm:$0xff] }
  0x71   : > { %749 = vmatpush.msrb.mxu2 %v409_v44  ;;  %886 = vmatpush.msrb.mxu3 %v457_v45  ;;  %v389_v44 = vld [vmem:[%s2272_s11 + $0xa0] sm:$0xff] }
  0x72   : > { %552 = vmatmul.f32.gmra.mxu2 %v331_v46  ;;  %1023 = vmatpush.msrb.mxu0 %v410_v48  ;;  %v437_v45 = vld [vmem:[%s2272_s11 + $0x220] sm:$0xff]  ;;  %v347_v48 = vld [vmem:[%s2262_s26 + $0x1d0] sm:$0xff] }
  0x73   : > { %689 = vmatmul.f32.gmra.mxu3 %v332_v47  ;;  %1160 = vmatpush.msrb.mxu1 %v458_v49  ;;  %v385_v46 = vld [vmem:[%s2272_s11 + $0x80] sm:$0xff]  ;;  %v348_v49 = vld [vmem:[%s2262_s26 + $0x1d8] sm:$0xff] }
  0x74   : > { %750 = vmatpush.msrb.mxu2 %v406_v50  ;;  %887 = vmatpush.msrb.mxu3 %v454_v51  ;;  %v433_v47 = vld [vmem:[%s2272_s11 + $0x200] sm:$0xff]  ;;  %v2445_v50 = vld [vmem:[%s2262_s26 + $0x90] sm:$0xff]  ;;  %v2448_v51 = vld [vmem:[%s2262_s26 + $0x98] sm:$0xff] }
  0x75   : > { %492 = vmatmul.f32.gmra.mxu0 %v2337_v52  ;;  %629 = vmatmul.f32.gmra.mxu1 %v2340_v53 }
  0x76   : > { %1024 = vmatpush.msrb.mxu0 %v407_v54  ;;  %1161 = vmatpush.msrb.mxu1 %v455_v55  ;;  %v386_v54 = vld [vmem:[%s2272_s11 + $0x88] sm:$0xff] }
  0x77   : > { %751 = vmatpush.msrb.mxu2 %v403_v56  ;;  %888 = vmatpush.msrb.mxu3 %v451_v57  ;;  %v434_v55 = vld [vmem:[%s2272_s11 + $0x208] sm:$0xff]  ;;  %v349_v57 = vld [vmem:[%s2262_s26 + $0x1e0] sm:$0xff] }
  0x78   : > { %1025 = vmatpush.msrb.mxu0 %v404_v58  ;;  %1162 = vmatpush.msrb.mxu1 %v452_v63  ;;  %v382_v56 = vld [vmem:[%s2272_s11 + $0x68] sm:$0xff] }
  0x79   : > { %752 = vmatpush.msrb.mxu2 %v400_v0  ;;  %889 = vmatpush.msrb.mxu3 %v448_v1  ;;  %v350_v58 = vld [vmem:[%s2262_s26 + $0x1e8] sm:$0xff]  ;;  %v383_v0 = vld [vmem:[%s2272_s11 + $0x70] sm:$0xff] }
  0x7a   : > { %555 = vmatmul.f32.gmra.mxu2 %v333_v59  ;;  %1026 = vmatpush.msrb.mxu0 %v401_v6  ;;  %v2458_v59 = vld [vmem:[%s2262_s26 + $0xa0] sm:$0xff]  ;;  %v430_v63 = vld [vmem:[%s2272_s11 + $0x1e8] sm:$0xff]  ;;  %v431_v1 = vld [vmem:[%s2272_s11 + $0x1f0] sm:$0xff] }
  0x7b   : > { %692 = vmatmul.f32.gmra.mxu3 %v334_v60  ;;  %1163 = vmatpush.msrb.mxu1 %v449_v7  ;;  %v2461_v60 = vld [vmem:[%s2262_s26 + $0xa8] sm:$0xff]  ;;  %v2471_v6 = vld [vmem:[%s2262_s26 + $0xb0] sm:$0xff]  ;;  %v2474_v7 = vld [vmem:[%s2262_s26 + $0xb8] sm:$0xff] }
  0x7c   : > { %753 = vmatpush.msrb.mxu2 %v397_v8  ;;  %890 = vmatpush.msrb.mxu3 %v445_v9  ;;  %v379_v8 = vld [vmem:[%s2272_s11 + $0x50] sm:$0xff] }
  0x7d   : > { %495 = vmatmul.f32.gmra.mxu0 %v2352_v61  ;;  %632 = vmatmul.f32.gmra.mxu1 %v2355_v62  ;;  %v427_v9 = vld [vmem:[%s2272_s11 + $0x1d0] sm:$0xff] }
  0x7e   : > { %1027 = vmatpush.msrb.mxu0 %v398_v14  ;;  %1164 = vmatpush.msrb.mxu1 %v446_v15  ;;  %v354_v14 = vld [vmem:[%s2262_s26 + $0x208] sm:$0xff]  ;;  %v2484_v15 = vld [vmem:[%s2262_s26 + $0xc0] sm:$0xff] }
  0x7f   : > { %754 = vmatpush.msrb.mxu2 %v394_v16  ;;  %891 = vmatpush.msrb.mxu3 %v442_v21  ;;  %v2487_v16 = vld [vmem:[%s2262_s26 + $0xc8] sm:$0xff]  ;;  %v424_v21 = vld [vmem:[%s2272_s11 + $0x1b8] sm:$0xff] }
  0x80   : > { %1028 = vmatpush.msrb.mxu0 %v395_v22  ;;  %1165 = vmatpush.msrb.mxu1 %v443_v23  ;;  %v355_v22 = vld [vmem:[%s2262_s26 + $0x210] sm:$0xff]  ;;  %v356_v23 = vld [vmem:[%s2262_s26 + $0x218] sm:$0xff] }
  0x81   : > { %755 = vmatpush.msrb.mxu2 %v391_v28  ;;  %892 = vmatpush.msrb.mxu3 %v439_v29  ;;  %v377_v28 = vld [vmem:[%s2272_s11 + $0x40] sm:$0xff] }
  0x82   : > { %558 = vmatmul.f32.gmra.mxu2 %v335_v2  ;;  %1029 = vmatpush.msrb.mxu0 %v392_v30  ;;  %v351_v2 = vld [vmem:[%s2262_s26 + $0x1f0] sm:$0xff]  ;;  %v425_v29 = vld [vmem:[%s2272_s11 + $0x1c0] sm:$0xff] }
  0x83   : > { %695 = vmatmul.f32.gmra.mxu3 %v336_v3  ;;  %1166 = vmatpush.msrb.mxu1 %v440_v35  ;;  %v352_v3 = vld [vmem:[%s2262_s26 + $0x1f8] sm:$0xff]  ;;  %v373_v30 = vld [vmem:[%s2272_s11 + $0x20] sm:$0xff] }
  0x84   : > { %756 = vmatpush.msrb.mxu2 %v388_v38  ;;  %893 = vmatpush.msrb.mxu3 %v436_v39  ;;  %v2510_v35 = vld [vmem:[%s2262_s26 + $0xe0] sm:$0xff]  ;;  %v2513_v38 = vld [vmem:[%s2262_s26 + $0xe8] sm:$0xff] }
  0x85   : > { %498 = vmatmul.f32.gmra.mxu0 %v2365_v4  ;;  %635 = vmatmul.f32.gmra.mxu1 %v2368_v5  ;;  %v421_v39 = vld [vmem:[%s2272_s11 + $0x1a0] sm:$0xff] }
  0x86   : > { %1030 = vmatpush.msrb.mxu0 %v389_v44  ;;  %1167 = vmatpush.msrb.mxu1 %v437_v45  ;;  %v359_v44 = vld [vmem:[%s2262_s26 + $0x230] sm:$0xff]  ;;  %v360_v45 = vld [vmem:[%s2262_s26 + $0x238] sm:$0xff] }
  0x87   : > { %757 = vmatpush.msrb.mxu2 %v385_v46  ;;  %894 = vmatpush.msrb.mxu3 %v433_v47  ;;  %v2525_v46 = vld [vmem:[%s2262_s26 + $0xf0] sm:$0xff]  ;;  %v2528_v47 = vld [vmem:[%s2262_s26 + $0xf8] sm:$0xff] }
  0x88   : > { %1031 = vmatpush.msrb.mxu0 %v386_v54  ;;  %1168 = vmatpush.msrb.mxu1 %v434_v55  ;;  %v2532_v54 = vld [vmem:[%s250_s6] sm:$0x7]  ;;  %v371_v55 = vld [vmem:[%s2272_s11 + $0x10] sm:$0xff] }
  0x89   : > { %758 = vmatpush.msrb.mxu2 %v382_v56  ;;  %895 = vmatpush.msrb.mxu3 %v430_v63  ;;  %v361_v56 = vld [vmem:[%s2262_s26 + $0x240] sm:$0xff] }
  0x8a   : > { %561 = vmatmul.f32.gmra.mxu2 %v337_v10  ;;  %1032 = vmatpush.msrb.mxu0 %v383_v0  ;;  %v380_v10 = vld [vmem:[%s2272_s11 + $0x58] sm:$0xff] }
  0x8b   : > { %698 = vmatmul.f32.gmra.mxu3 %v338_v11  ;;  %1169 = vmatpush.msrb.mxu1 %v431_v1  ;;  %v353_v11 = vld [vmem:[%s2262_s26 + $0x200] sm:$0xff] }
  0x8c   : > { %759 = vmatpush.msrb.mxu2 %v379_v8  ;;  %896 = vmatpush.msrb.mxu3 %v427_v9  ;;  %v2546_v1 = vld [vmem:[%s2262_s26 + $0x100] sm:$0xff] }
  0x8d   : > { %501 = vmatmul.f32.gmra.mxu0 %v2379_v12  ;;  %638 = vmatmul.f32.gmra.mxu1 %v2382_v13 }
  0x8e   : > { %1033 = vmatpush.msrb.mxu0 %v380_v10  ;;  %897 = vmatpush.msrb.mxu3 %v424_v21 }
  0x90   : > { %1034 = vmatpush.msrb.mxu0 %v377_v28  ;;  %898 = vmatpush.msrb.mxu3 %v421_v39  ;;  %v2563_v28 = vld [vmem:[%s2262_s26 + $0x110] sm:$0xff] }
  0x92   : > { %564 = vmatmul.f32.gmra.mxu2 %v339_v17  ;;  %v428_v17 = vld [vmem:[%s2272_s11 + $0x1d8] sm:$0xff] }
  0x93   : > { %701 = vmatmul.f32.gmra.mxu3 %v340_v18  ;;  %v376_v18 = vld [vmem:[%s2272_s11 + $0x38] sm:$0xff]  ;;  %1170 = vmatpush.msrb.mxu1 %v428_v17  ;;  %v363_v17 = vld [vmem:[%s2262_s26 + $0x250] sm:$0xff] }
  0x94   : > { %760 = vmatpush.msrb.mxu2 %v376_v18  ;;  %v364_v18 = vld [vmem:[%s2262_s26 + $0x258] sm:$0xff] }
  0x95   : > { %504 = vmatmul.f32.gmra.mxu0 %v2392_v19  ;;  %641 = vmatmul.f32.gmra.mxu1 %v2395_v20 }
  0x96   : > { %1171 = vmatpush.msrb.mxu1 %v425_v29  ;;  %761 = vmatpush.msrb.mxu2 %v373_v30  ;;  %v2566_v29 = vld [vmem:[%s2262_s26 + $0x118] sm:$0xff] }
  0x9a   : > { %567 = vmatmul.f32.gmra.mxu2 %v341_v24  ;;  %v2497_v24 = vld [vmem:[%s2262_s26 + $0xd0] sm:$0xff] }
  0x9b   : > { %704 = vmatmul.f32.gmra.mxu3 %v342_v25  ;;  %v2500_v25 = vld [vmem:[%s2262_s26 + $0xd8] sm:$0xff] }
  0x9d   : > { %507 = vmatmul.f32.gmra.mxu0 %v2405_v26  ;;  %644 = vmatmul.f32.gmra.mxu1 %v2408_v27 }
  0xa2   : > { %570 = vmatmul.f32.gmra.mxu2 %v343_v31  ;;  %v357_v31 = vld [vmem:[%s2262_s26 + $0x220] sm:$0xff] }
  0xa3   : > { %707 = vmatmul.f32.gmra.mxu3 %v344_v32  ;;  %v358_v32 = vld [vmem:[%s2262_s26 + $0x228] sm:$0xff] }
  0xa5   : > { %510 = vmatmul.f32.gmra.mxu0 %v2418_v33  ;;  %647 = vmatmul.f32.gmra.mxu1 %v2421_v34 }
  0xaa   : > { %573 = vmatmul.f32.gmra.mxu2 %v345_v40  ;;  %v374_v40 = vld [vmem:[%s2272_s11 + $0x28] sm:$0xff] }
  0xab   : > { %710 = vmatmul.f32.gmra.mxu3 %v346_v41  ;;  %1035 = vmatpush.msrb.mxu0 %v374_v40  ;;  %v422_v41 = vld [vmem:[%s2272_s11 + $0x1a8] sm:$0xff] }
  0xac   : > { %1172 = vmatpush.msrb.mxu1 %v422_v41  ;;  %v365_v41 = vld [vmem:[%s2262_s26 + $0x260] sm:$0xff] }
  0xad   : > { %513 = vmatmul.f32.gmra.mxu0 %v2431_v42  ;;  %650 = vmatmul.f32.gmra.mxu1 %v2434_v43 }
  0xae   : > { %1036 = vmatpush.msrb.mxu0 %v371_v55  ;;  %v2577_v55 = vld [vmem:[%s2262_s26 + $0x120] sm:$0xff] }
  0xb2   : > { %576 = vmatmul.f32.gmra.mxu2 %v347_v48  ;;  %v370_v48 = vld [vmem:[%s2272_s11 + $0x8] sm:$0xff] }
  0xb3   : > { %713 = vmatmul.f32.gmra.mxu3 %v348_v49  ;;  %v418_v49 = vld [vmem:[%s2272_s11 + $0x188] sm:$0xff]  ;;  %762 = vmatpush.msrb.mxu2 %v370_v48 }
  0xb4   : > { %899 = vmatpush.msrb.mxu3 %v418_v49 }
  0xb5   : > { %516 = vmatmul.f32.gmra.mxu0 %v2445_v50  ;;  %653 = vmatmul.f32.gmra.mxu1 %v2448_v51 }
  0xba   : > { %579 = vmatmul.f32.gmra.mxu2 %v349_v57  ;;  %v362_v57 = vld [vmem:[%s2262_s26 + $0x248] sm:$0xff] }
  0xbb   : > { %716 = vmatmul.f32.gmra.mxu3 %v350_v58  ;;  %v2541_v58 = vperm.slane %v2532_v54, 0 }
  0xbd   : > { %519 = vmatmul.f32.gmra.mxu0 %v2458_v59  ;;  %656 = vmatmul.f32.gmra.mxu1 %v2461_v60 }
  0xc2   : > { %582 = vmatmul.f32.gmra.mxu2 %v351_v2  ;;  %v2549_v2 = vld [vmem:[%s2262_s26 + $0x108] sm:$0xff] }
  0xc3   : > { %719 = vmatmul.f32.gmra.mxu3 %v352_v3  ;;  %v419_v3 = vld [vmem:[%s2272_s11 + $0x190] sm:$0xff] }
  0xc4   : > { %1173 = vmatpush.msrb.mxu1 %v419_v3 }
  0xc5   : > { %522 = vmatmul.f32.gmra.mxu0 %v2471_v6  ;;  %659 = vmatmul.f32.gmra.mxu1 %v2474_v7 }
  0xca   : > { %585 = vmatmul.f32.gmra.mxu2 %v353_v11 }
  0xcb   : > { %722 = vmatmul.f32.gmra.mxu3 %v354_v14 }
  0xcd   : > { %525 = vmatmul.f32.gmra.mxu0 %v2484_v15  ;;  %662 = vmatmul.f32.gmra.mxu1 %v2487_v16 }
  0xd2   : > { %588 = vmatmul.f32.gmra.mxu2 %v355_v22 }
  0xd3   : > { %725 = vmatmul.f32.gmra.mxu3 %v356_v23 }
  0xd5   : > { %528 = vmatmul.f32.gmra.mxu0 %v2497_v24  ;;  %665 = vmatmul.f32.gmra.mxu1 %v2500_v25 }
  0xda   : > { %591 = vmatmul.f32.gmra.mxu2 %v357_v31 }
  0xdb   : > { %728 = vmatmul.f32.gmra.mxu3 %v358_v32 }
  0xdd   : > { %531 = vmatmul.f32.gmra.mxu0 %v2510_v35  ;;  %668 = vmatmul.f32.gmra.mxu1 %v2513_v38 }
  0xe2   : > { %594 = vmatmul.f32.gmra.mxu2 %v359_v44  ;;  %v366_v44 = vld [vmem:[%s2262_s26 + $0x268] sm:$0xff] }
  0xe3   : > { %731 = vmatmul.f32.gmra.mxu3 %v360_v45 }
  0xe5   : > { %534 = vmatmul.f32.gmra.mxu0 %v2525_v46  ;;  %671 = vmatmul.f32.gmra.mxu1 %v2528_v47 }
  0xea   : > { %597 = vmatmul.f32.gmra.mxu2 %v361_v56  ;;  %v490_v63 = vpop.f32.mrf.mxu0  ;;  %v627_v0 = vpop.f32.mrf.mxu1  ;;  %v2580_v56 = vld [vmem:[%s2262_s26 + $0x128] sm:$0xff] }
  0xeb   : > { %734 = vmatmul.f32.gmra.mxu3 %v362_v57  ;;  %v491_v8 = vadd.f32 %v490_v63, %v2541_v58 }
  0xed   : > { %v550_v9 = vpop.f32.mrf.mxu2  ;;  %v628_v10 = vadd.f32 %v627_v0, %v491_v8  ;;  %537 = vmatmul.f32.gmra.mxu0 %v2546_v1  ;;  %674 = vmatmul.f32.gmra.mxu1 %v2549_v2 }
  0xee   : > { %v687_v11 = vpop.f32.mrf.mxu3  ;;  %v551_v14 = vadd.f32 %v550_v9, %v2541_v58  ;;  %v367_v9 = vld [vmem:[%s2262_s26 + $0x270] sm:$0xff] }
  0xef   : > { %1295 = vst [vmem:[%s2556_s15] sm:$0xff] %v628_v10  ;;  %v368_v10 = vld [vmem:[%s2262_s26 + $0x278] sm:$0xff] }
  0xf0   : > { %v688_v21 = vadd.f32 %v687_v11, %v551_v14 }
  0xf2   : > { %1355 = vst [vmem:[%s2556_s15 + $0x1e0] sm:$0xff] %v688_v21  ;;  %600 = vmatmul.f32.gmra.mxu2 %v363_v17  ;;  %v493_v22 = vpop.f32.mrf.mxu0  ;;  %v630_v23 = vpop.f32.mrf.mxu1  ;;  %v2594_v21 = vld [vmem:[%s2262_s26 + $0x138] sm:$0xff] }
  0xf3   : > { %737 = vmatmul.f32.gmra.mxu3 %v364_v18  ;;  %v494_v30 = vadd.f32 %v493_v22, %v2541_v58  ;;  %v2591_v18 = vld [vmem:[%s2262_s26 + $0x130] sm:$0xff] }
  0xf5   : > { %v553_v31 = vpop.f32.mrf.mxu2  ;;  %v631_v32 = vadd.f32 %v630_v23, %v494_v30  ;;  %540 = vmatmul.f32.gmra.mxu0 %v2563_v28  ;;  %677 = vmatmul.f32.gmra.mxu1 %v2566_v29 }
  0xf6   : > { %v690_v39 = vpop.f32.mrf.mxu3  ;;  %v554_v40 = vadd.f32 %v553_v31, %v2541_v58 }
  0xf7   : > { %1298 = vst [vmem:[%s2556_s15 + $0x18] sm:$0xff] %v631_v32 }
  0xf8   : > { %v691_v45 = vadd.f32 %v690_v39, %v554_v40 }
  0xfa   : > { %1358 = vst [vmem:[%s2556_s15 + $0x1f8] sm:$0xff] %v691_v45  ;;  %603 = vmatmul.f32.gmra.mxu2 %v365_v41  ;;  %v496_v48 = vpop.f32.mrf.mxu0  ;;  %v633_v49 = vpop.f32.mrf.mxu1 }
  0xfb   : > { %740 = vmatmul.f32.gmra.mxu3 %v366_v44  ;;  %v497_v57 = vadd.f32 %v496_v48, %v2541_v58 }
  0xfd   : > { %v556_v63 = vpop.f32.mrf.mxu2  ;;  %v634_v0 = vadd.f32 %v633_v49, %v497_v57  ;;  %543 = vmatmul.f32.gmra.mxu0 %v2577_v55  ;;  %680 = vmatmul.f32.gmra.mxu1 %v2580_v56 }
  0xfe   : > { %v693_v3 = vpop.f32.mrf.mxu3  ;;  %v557_v8 = vadd.f32 %v556_v63, %v2541_v58 }
  0xff   : > { %1301 = vst [vmem:[%s2556_s15 + $0x30] sm:$0xff] %v634_v0 }
 0x100   : > { %v694_v11 = vadd.f32 %v693_v3, %v557_v8 }
 0x102   : > { %1361 = vst [vmem:[%s2556_s15 + $0x210] sm:$0xff] %v694_v11  ;;  %606 = vmatmul.f32.gmra.mxu2 %v367_v9  ;;  %v499_v14 = vpop.f32.mrf.mxu0  ;;  %v636_v17 = vpop.f32.mrf.mxu1 }
 0x103   : > { %743 = vmatmul.f32.gmra.mxu3 %v368_v10  ;;  %v500_v22 = vadd.f32 %v499_v14, %v2541_v58 }
 0x105   : > { %v559_v23 = vpop.f32.mrf.mxu2  ;;  %v637_v30 = vadd.f32 %v636_v17, %v500_v22  ;;  %546 = vmatmul.f32.gmra.mxu0 %v2591_v18  ;;  %683 = vmatmul.f32.gmra.mxu1 %v2594_v21 }
 0x106   : > { %v696_v31 = vpop.f32.mrf.mxu3  ;;  %v560_v32 = vadd.f32 %v559_v23, %v2541_v58 }
 0x107   : > { %1304 = vst [vmem:[%s2556_s15 + $0x48] sm:$0xff] %v637_v30 }
 0x108   : > { %v697_v39 = vadd.f32 %v696_v31, %v560_v32 }
 0x10a   : > { %1364 = vst [vmem:[%s2556_s15 + $0x228] sm:$0xff] %v697_v39  ;;  %763 = vmatmul.f32.vlgmr.msrb.gmra.mxu2 %v2315_v36  ;;  %v502_v40 = vpop.f32.mrf.mxu0  ;;  %v639_v41 = vpop.f32.mrf.mxu1 }
 0x10b   : > { %900 = vmatmul.f32.vlgmr.msrb.gmra.mxu3 %v2318_v37  ;;  %v503_v44 = vadd.f32 %v502_v40, %v2541_v58 }
 0x10d   : > { %v562_v45 = vpop.f32.mrf.mxu2  ;;  %v640_v48 = vadd.f32 %v639_v41, %v503_v44  ;;  %1037 = vmatmul.f32.vlgmr.msrb.gmra.mxu0 %v2315_v36  ;;  %1174 = vmatmul.f32.vlgmr.msrb.gmra.mxu1 %v2318_v37 }
 0x10e   : > { %v699_v49 = vpop.f32.mrf.mxu3  ;;  %v563_v57 = vadd.f32 %v562_v45, %v2541_v58 }
 0x10f   : > { %1307 = vst [vmem:[%s2556_s15 + $0x60] sm:$0xff] %v640_v48 }
 0x110   : > { %v700_v63 = vadd.f32 %v699_v49, %v563_v57 }
 0x112   : > { %1367 = vst [vmem:[%s2556_s15 + $0x240] sm:$0xff] %v700_v63  ;;  %766 = vmatmul.f32.gmra.mxu2 %v2337_v52  ;;  %v505_v0 = vpop.f32.mrf.mxu0  ;;  %v642_v3 = vpop.f32.mrf.mxu1 }
 0x113   : > { %903 = vmatmul.f32.gmra.mxu3 %v2340_v53  ;;  %v506_v8 = vadd.f32 %v505_v0, %v2541_v58 }
 0x115   : > { %v565_v9 = vpop.f32.mrf.mxu2  ;;  %v643_v10 = vadd.f32 %v642_v3, %v506_v8  ;;  %1040 = vmatmul.f32.gmra.mxu0 %v2337_v52  ;;  %1177 = vmatmul.f32.gmra.mxu1 %v2340_v53 }
 0x116   : > { %v702_v36 = vpop.f32.mrf.mxu3  ;;  %v566_v37 = vadd.f32 %v565_v9, %v2541_v58 }
 0x117   : > { %1310 = vst [vmem:[%s2556_s15 + $0x78] sm:$0xff] %v643_v10 }
 0x118   : > { %v703_v11 = vadd.f32 %v702_v36, %v566_v37 }
 0x11a   : > { %1370 = vst [vmem:[%s2556_s15 + $0x258] sm:$0xff] %v703_v11  ;;  %769 = vmatmul.f32.gmra.mxu2 %v2352_v61  ;;  %v508_v14 = vpop.f32.mrf.mxu0  ;;  %v645_v17 = vpop.f32.mrf.mxu1 }
 0x11b   : > { %906 = vmatmul.f32.gmra.mxu3 %v2355_v62  ;;  %v509_v22 = vadd.f32 %v508_v14, %v2541_v58 }
 0x11d   : > { %v568_v23 = vpop.f32.mrf.mxu2  ;;  %v646_v30 = vadd.f32 %v645_v17, %v509_v22  ;;  %1043 = vmatmul.f32.gmra.mxu0 %v2352_v61  ;;  %1180 = vmatmul.f32.gmra.mxu1 %v2355_v62 }
 0x11e   : > { %v705_v52 = vpop.f32.mrf.mxu3  ;;  %v569_v53 = vadd.f32 %v568_v23, %v2541_v58 }
 0x11f   : > { %1313 = vst [vmem:[%s2556_s15 + $0x90] sm:$0xff] %v646_v30 }
 0x120   : > { %v706_v31 = vadd.f32 %v705_v52, %v569_v53 }
 0x122   : > { %1373 = vst [vmem:[%s2556_s15 + $0x270] sm:$0xff] %v706_v31  ;;  %772 = vmatmul.f32.gmra.mxu2 %v2365_v4  ;;  %v511_v32 = vpop.f32.mrf.mxu0  ;;  %v648_v39 = vpop.f32.mrf.mxu1 }
 0x123   : > { %909 = vmatmul.f32.gmra.mxu3 %v2368_v5  ;;  %v512_v40 = vadd.f32 %v511_v32, %v2541_v58 }
 0x125   : > { %v571_v41 = vpop.f32.mrf.mxu2  ;;  %v649_v44 = vadd.f32 %v648_v39, %v512_v40  ;;  %1046 = vmatmul.f32.gmra.mxu0 %v2365_v4  ;;  %1183 = vmatmul.f32.gmra.mxu1 %v2368_v5 }
 0x126   : > { %v708_v61 = vpop.f32.mrf.mxu3  ;;  %v572_v62 = vadd.f32 %v571_v41, %v2541_v58 }
 0x127   : > { %1316 = vst [vmem:[%s2556_s15 + $0xa8] sm:$0xff] %v649_v44 }
 0x128   : > { %v709_v45 = vadd.f32 %v708_v61, %v572_v62 }
 0x12a   : > { %1376 = vst [vmem:[%s2556_s15 + $0x288] sm:$0xff] %v709_v45  ;;  %775 = vmatmul.f32.gmra.mxu2 %v2379_v12  ;;  %v514_v48 = vpop.f32.mrf.mxu0  ;;  %v651_v49 = vpop.f32.mrf.mxu1 }
 0x12b   : > { %912 = vmatmul.f32.gmra.mxu3 %v2382_v13  ;;  %v515_v57 = vadd.f32 %v514_v48, %v2541_v58 }
 0x12d   : > { %v574_v63 = vpop.f32.mrf.mxu2  ;;  %v652_v0 = vadd.f32 %v651_v49, %v515_v57  ;;  %1049 = vmatmul.f32.gmra.mxu0 %v2379_v12  ;;  %1186 = vmatmul.f32.gmra.mxu1 %v2382_v13 }
 0x12e   : > { %v711_v4 = vpop.f32.mrf.mxu3  ;;  %v575_v5 = vadd.f32 %v574_v63, %v2541_v58 }
 0x12f   : > { %1319 = vst [vmem:[%s2556_s15 + $0xc0] sm:$0xff] %v652_v0 }
 0x130   : > { %v712_v3 = vadd.f32 %v711_v4, %v575_v5 }
 0x132   : > { %1379 = vst [vmem:[%s2556_s15 + $0x2a0] sm:$0xff] %v712_v3  ;;  %778 = vmatmul.f32.gmra.mxu2 %v2392_v19  ;;  %v517_v8 = vpop.f32.mrf.mxu0  ;;  %v654_v9 = vpop.f32.mrf.mxu1 }
 0x133   : > { %915 = vmatmul.f32.gmra.mxu3 %v2395_v20  ;;  %v518_v10 = vadd.f32 %v517_v8, %v2541_v58 }
 0x135   : > { %v577_v36 = vpop.f32.mrf.mxu2  ;;  %v655_v37 = vadd.f32 %v654_v9, %v518_v10  ;;  %1052 = vmatmul.f32.gmra.mxu0 %v2392_v19  ;;  %1189 = vmatmul.f32.gmra.mxu1 %v2395_v20 }
 0x136   : > { %v714_v12 = vpop.f32.mrf.mxu3  ;;  %v578_v13 = vadd.f32 %v577_v36, %v2541_v58 }
 0x137   : > { %1322 = vst [vmem:[%s2556_s15 + $0xd8] sm:$0xff] %v655_v37 }
 0x138   : > { %v715_v11 = vadd.f32 %v714_v12, %v578_v13 }
 0x13a   : > { %1382 = vst [vmem:[%s2556_s15 + $0x2b8] sm:$0xff] %v715_v11  ;;  %781 = vmatmul.f32.gmra.mxu2 %v2405_v26  ;;  %v520_v14 = vpop.f32.mrf.mxu0  ;;  %v657_v17 = vpop.f32.mrf.mxu1 }
 0x13b   : > { %918 = vmatmul.f32.gmra.mxu3 %v2408_v27  ;;  %v521_v22 = vadd.f32 %v520_v14, %v2541_v58 }
 0x13d   : > { %v580_v23 = vpop.f32.mrf.mxu2  ;;  %v658_v30 = vadd.f32 %v657_v17, %v521_v22  ;;  %1055 = vmatmul.f32.gmra.mxu0 %v2405_v26  ;;  %1192 = vmatmul.f32.gmra.mxu1 %v2408_v27 }
 0x13e   : > { %v717_v19 = vpop.f32.mrf.mxu3  ;;  %v581_v20 = vadd.f32 %v580_v23, %v2541_v58 }
 0x13f   : > { %1325 = vst [vmem:[%s2556_s15 + $0xf0] sm:$0xff] %v658_v30 }
 0x140   : > { %v718_v52 = vadd.f32 %v717_v19, %v581_v20 }
 0x142   : > { %1385 = vst [vmem:[%s2556_s15 + $0x2d0] sm:$0xff] %v718_v52  ;;  %784 = vmatmul.f32.gmra.mxu2 %v2418_v33  ;;  %v523_v53 = vpop.f32.mrf.mxu0  ;;  %v660_v31 = vpop.f32.mrf.mxu1 }
 0x143   : > { %921 = vmatmul.f32.gmra.mxu3 %v2421_v34  ;;  %v524_v32 = vadd.f32 %v523_v53, %v2541_v58 }
 0x145   : > { %v583_v39 = vpop.f32.mrf.mxu2  ;;  %v661_v40 = vadd.f32 %v660_v31, %v524_v32  ;;  %1058 = vmatmul.f32.gmra.mxu0 %v2418_v33  ;;  %1195 = vmatmul.f32.gmra.mxu1 %v2421_v34 }
 0x146   : > { %v720_v26 = vpop.f32.mrf.mxu3  ;;  %v584_v27 = vadd.f32 %v583_v39, %v2541_v58 }
 0x147   : > { %1328 = vst [vmem:[%s2556_s15 + $0x108] sm:$0xff] %v661_v40 }
 0x148   : > { %v721_v41 = vadd.f32 %v720_v26, %v584_v27 }
 0x14a   : > { %1388 = vst [vmem:[%s2556_s15 + $0x2e8] sm:$0xff] %v721_v41  ;;  %787 = vmatmul.f32.gmra.mxu2 %v2431_v42  ;;  %v526_v44 = vpop.f32.mrf.mxu0  ;;  %v663_v61 = vpop.f32.mrf.mxu1 }
 0x14b   : > { %924 = vmatmul.f32.gmra.mxu3 %v2434_v43  ;;  %v527_v62 = vadd.f32 %v526_v44, %v2541_v58 }
 0x14d   : > { %v586_v45 = vpop.f32.mrf.mxu2  ;;  %v664_v48 = vadd.f32 %v663_v61, %v527_v62  ;;  %1061 = vmatmul.f32.gmra.mxu0 %v2431_v42  ;;  %1198 = vmatmul.f32.gmra.mxu1 %v2434_v43 }
 0x14e   : > { %v723_v33 = vpop.f32.mrf.mxu3  ;;  %v587_v34 = vadd.f32 %v586_v45, %v2541_v58 }
 0x14f   : > { %1331 = vst [vmem:[%s2556_s15 + $0x120] sm:$0xff] %v664_v48 }
 0x150   : > { %v724_v49 = vadd.f32 %v723_v33, %v587_v34 }
 0x152   : > { %1391 = vst [vmem:[%s2556_s15 + $0x300] sm:$0xff] %v724_v49  ;;  %790 = vmatmul.f32.gmra.mxu2 %v2445_v50  ;;  %v529_v57 = vpop.f32.mrf.mxu0  ;;  %v666_v63 = vpop.f32.mrf.mxu1 }
 0x153   : > { %927 = vmatmul.f32.gmra.mxu3 %v2448_v51  ;;  %v530_v0 = vadd.f32 %v529_v57, %v2541_v58 }
 0x155   : > { %v589_v4 = vpop.f32.mrf.mxu2  ;;  %v667_v5 = vadd.f32 %v666_v63, %v530_v0  ;;  %1064 = vmatmul.f32.gmra.mxu0 %v2445_v50  ;;  %1201 = vmatmul.f32.gmra.mxu1 %v2448_v51 }
 0x156   : > { %v726_v42 = vpop.f32.mrf.mxu3  ;;  %v590_v43 = vadd.f32 %v589_v4, %v2541_v58  ;;  %v2730_v4 = vperm.slane %v2532_v54, 2 }
 0x157   : > { %1334 = vst [vmem:[%s2556_s15 + $0x138] sm:$0xff] %v667_v5 }
 0x158   : > { %v727_v3 = vadd.f32 %v726_v42, %v590_v43  ;;  %v2736_v42 = vperm.slane %v2532_v54, 1 }
 0x15a   : > { %1394 = vst [vmem:[%s2556_s15 + $0x318] sm:$0xff] %v727_v3  ;;  %793 = vmatmul.f32.gmra.mxu2 %v2458_v59  ;;  %v532_v8 = vpop.f32.mrf.mxu0  ;;  %v669_v9 = vpop.f32.mrf.mxu1 }
 0x15b   : > { %930 = vmatmul.f32.gmra.mxu3 %v2461_v60  ;;  %v533_v10 = vadd.f32 %v532_v8, %v2541_v58 }
 0x15d   : > { %v592_v36 = vpop.f32.mrf.mxu2  ;;  %v670_v37 = vadd.f32 %v669_v9, %v533_v10  ;;  %1067 = vmatmul.f32.gmra.mxu0 %v2458_v59  ;;  %1204 = vmatmul.f32.gmra.mxu1 %v2461_v60 }
 0x15e   : > { %v729_v50 = vpop.f32.mrf.mxu3  ;;  %v593_v51 = vadd.f32 %v592_v36, %v2541_v58 }
 0x15f   : > { %1337 = vst [vmem:[%s2556_s15 + $0x150] sm:$0xff] %v670_v37 }
 0x160   : > { %v730_v12 = vadd.f32 %v729_v50, %v593_v51 }
 0x162   : > { %1397 = vst [vmem:[%s2556_s15 + $0x330] sm:$0xff] %v730_v12  ;;  %796 = vmatmul.f32.gmra.mxu2 %v2471_v6  ;;  %v535_v13 = vpop.f32.mrf.mxu0  ;;  %v672_v11 = vpop.f32.mrf.mxu1 }
 0x163   : > { %933 = vmatmul.f32.gmra.mxu3 %v2474_v7  ;;  %v536_v14 = vadd.f32 %v535_v13, %v2541_v58 }
 0x165   : > { %v595_v17 = vpop.f32.mrf.mxu2  ;;  %v673_v22 = vadd.f32 %v672_v11, %v536_v14  ;;  %1070 = vmatmul.f32.gmra.mxu0 %v2471_v6  ;;  %1207 = vmatmul.f32.gmra.mxu1 %v2474_v7 }
 0x166   : > { %v732_v59 = vpop.f32.mrf.mxu3  ;;  %v596_v60 = vadd.f32 %v595_v17, %v2541_v58 }
 0x167   : > { %1340 = vst [vmem:[%s2556_s15 + $0x168] sm:$0xff] %v673_v22 }
 0x168   : > { %v733_v23 = vadd.f32 %v732_v59, %v596_v60 }
 0x16a   : > { %1400 = vst [vmem:[%s2556_s15 + $0x348] sm:$0xff] %v733_v23  ;;  %799 = vmatmul.f32.gmra.mxu2 %v2484_v15  ;;  %v538_v30 = vpop.f32.mrf.mxu0  ;;  %v675_v19 = vpop.f32.mrf.mxu1 }
 0x16b   : > { %936 = vmatmul.f32.gmra.mxu3 %v2487_v16  ;;  %v539_v20 = vadd.f32 %v538_v30, %v2541_v58 }
 0x16d   : > { %v598_v52 = vpop.f32.mrf.mxu2  ;;  %v676_v53 = vadd.f32 %v675_v19, %v539_v20  ;;  %1073 = vmatmul.f32.gmra.mxu0 %v2484_v15  ;;  %1210 = vmatmul.f32.gmra.mxu1 %v2487_v16 }
 0x16e   : > { %v735_v6 = vpop.f32.mrf.mxu3  ;;  %v599_v7 = vadd.f32 %v598_v52, %v2541_v58 }
 0x16f   : > { %1343 = vst [vmem:[%s2556_s15 + $0x180] sm:$0xff] %v676_v53  ;;  %v1764_v53 = vld [vmem:[%s2262_s26 + $0x140] sm:$0xff] }
 0x170   : > { %v736_v31 = vadd.f32 %v735_v6, %v599_v7  ;;  %v1765_v6 = vld [vmem:[%s2262_s26 + $0x148] sm:$0xff] }
 0x172   : > { %1403 = vst [vmem:[%s2556_s15 + $0x360] sm:$0xff] %v736_v31  ;;  %802 = vmatmul.f32.gmra.mxu2 %v2497_v24  ;;  %v541_v32 = vpop.f32.mrf.mxu0  ;;  %v678_v39 = vpop.f32.mrf.mxu1 }
 0x173   : > { %939 = vmatmul.f32.gmra.mxu3 %v2500_v25  ;;  %v542_v40 = vadd.f32 %v541_v32, %v2541_v58 }
 0x175   : > { %v601_v26 = vpop.f32.mrf.mxu2  ;;  %v679_v27 = vadd.f32 %v678_v39, %v542_v40  ;;  %1076 = vmatmul.f32.gmra.mxu0 %v2497_v24  ;;  %1213 = vmatmul.f32.gmra.mxu1 %v2500_v25 }
 0x176   : > { %v738_v15 = vpop.f32.mrf.mxu3  ;;  %v602_v16 = vadd.f32 %v601_v26, %v2541_v58 }
 0x177   : > { %1346 = vst [vmem:[%s2556_s15 + $0x198] sm:$0xff] %v679_v27  ;;  %v1766_v27 = vld [vmem:[%s2262_s26 + $0x150] sm:$0xff] }
 0x178   : > { %v739_v41 = vadd.f32 %v738_v15, %v602_v16  ;;  %v1767_v15 = vld [vmem:[%s2262_s26 + $0x158] sm:$0xff] }
 0x17a   : > { %1406 = vst [vmem:[%s2556_s15 + $0x378] sm:$0xff] %v739_v41  ;;  %805 = vmatmul.f32.gmra.mxu2 %v2510_v35  ;;  %v544_v44 = vpop.f32.mrf.mxu0  ;;  %v681_v61 = vpop.f32.mrf.mxu1 }
 0x17b   : > { %942 = vmatmul.f32.gmra.mxu3 %v2513_v38  ;;  %v545_v62 = vadd.f32 %v544_v44, %v2541_v58 }
 0x17d   : > { %v604_v45 = vpop.f32.mrf.mxu2  ;;  %v682_v48 = vadd.f32 %v681_v61, %v545_v62  ;;  %1079 = vmatmul.f32.gmra.mxu0 %v2510_v35  ;;  %1216 = vmatmul.f32.gmra.mxu1 %v2513_v38 }
 0x17e   : > { %v741_v24 = vpop.f32.mrf.mxu3  ;;  %v605_v25 = vadd.f32 %v604_v45, %v2541_v58 }
 0x17f   : > { %1349 = vst [vmem:[%s2556_s15 + $0x1b0] sm:$0xff] %v682_v48 }
 0x180   : > { %v742_v33 = vadd.f32 %v741_v24, %v605_v25  ;;  %v1768_v25 = vld [vmem:[%s2262_s26 + $0x160] sm:$0xff] }
 0x182   : > { %1409 = vst [vmem:[%s2556_s15 + $0x390] sm:$0xff] %v742_v33  ;;  %808 = vmatmul.f32.gmra.mxu2 %v2525_v46  ;;  %v547_v34 = vpop.f32.mrf.mxu0  ;;  %v684_v49 = vpop.f32.mrf.mxu1  ;;  %v1769_v33 = vld [vmem:[%s2262_s26 + $0x168] sm:$0xff] }
 0x183   : > { %945 = vmatmul.f32.gmra.mxu3 %v2528_v47  ;;  %v548_v57 = vadd.f32 %v547_v34, %v2541_v58 }
 0x185   : > { %v607_v63 = vpop.f32.mrf.mxu2  ;;  %v685_v0 = vadd.f32 %v684_v49, %v548_v57  ;;  %1082 = vmatmul.f32.gmra.mxu0 %v2525_v46  ;;  %1219 = vmatmul.f32.gmra.mxu1 %v2528_v47 }
 0x186   : > { %v744_v35 = vpop.f32.mrf.mxu3  ;;  %v608_v38 = vadd.f32 %v607_v63, %v2541_v58 }
 0x187   : > { %1352 = vst [vmem:[%s2556_s15 + $0x1c8] sm:$0xff] %v685_v0 }
 0x188   : > { %v745_v5 = vadd.f32 %v744_v35, %v608_v38 }
 0x18a   : > { %1412 = vst [vmem:[%s2556_s15 + $0x3a8] sm:$0xff] %v745_v5  ;;  %811 = vmatmul.f32.gmra.mxu2 %v2546_v1  ;;  %v1038_v46 = vpop.f32.mrf.mxu0  ;;  %v1175_v43 = vpop.f32.mrf.mxu1 }
 0x18b   : > { %948 = vmatmul.f32.gmra.mxu3 %v2549_v2  ;;  %v1039_v47 = vadd.f32 %v1038_v46, %v2730_v4  ;;  %v1770_v46 = vld [vmem:[%s2262_s26 + $0x170] sm:$0xff] }
 0x18d   : > { %v764_v58 = vpop.f32.mrf.mxu2  ;;  %v1176_v8 = vadd.f32 %v1175_v43, %v1039_v47  ;;  %1085 = vmatmul.f32.gmra.mxu0 %v2546_v1  ;;  %1222 = vmatmul.f32.gmra.mxu1 %v2549_v2  ;;  %v1771_v43 = vld [vmem:[%s2262_s26 + $0x178] sm:$0xff] }
 0x18e   : > { %v901_v3 = vpop.f32.mrf.mxu3  ;;  %v765_v9 = vadd.f32 %v764_v58, %v2736_v42 }
 0x18f   : > { %1297 = vst [vmem:[%s2556_s15 + $0x10] sm:$0xff] %v1176_v8 }
 0x190   : > { %v902_v10 = vadd.f32 %v901_v3, %v765_v9 }
 0x192   : > { %1296 = vst [vmem:[%s2556_s15 + $0x8] sm:$0xff] %v902_v10  ;;  %814 = vmatmul.f32.gmra.mxu2 %v2563_v28  ;;  %v1041_v54 = vpop.f32.mrf.mxu0  ;;  %v1178_v36 = vpop.f32.mrf.mxu1 }
 0x193   : > { %951 = vmatmul.f32.gmra.mxu3 %v2566_v29  ;;  %v1042_v37 = vadd.f32 %v1041_v54, %v2730_v4 }
 0x195   : > { %v767_v50 = vpop.f32.mrf.mxu2  ;;  %v1179_v1 = vadd.f32 %v1178_v36, %v1042_v37  ;;  %1088 = vmatmul.f32.gmra.mxu0 %v2563_v28  ;;  %1225 = vmatmul.f32.gmra.mxu1 %v2566_v29  ;;  %v1772_v37 = vld [vmem:[%s2262_s26 + $0x180] sm:$0xff] }
 0x196   : > { %v904_v51 = vpop.f32.mrf.mxu3  ;;  %v768_v2 = vadd.f32 %v767_v50, %v2736_v42  ;;  %v1773_v50 = vld [vmem:[%s2262_s26 + $0x188] sm:$0xff] }
 0x197   : > { %1300 = vst [vmem:[%s2556_s15 + $0x28] sm:$0xff] %v1179_v1 }
 0x198   : > { %v905_v12 = vadd.f32 %v904_v51, %v768_v2 }
 0x19a   : > { %1299 = vst [vmem:[%s2556_s15 + $0x20] sm:$0xff] %v905_v12  ;;  %817 = vmatmul.f32.gmra.mxu2 %v2577_v55  ;;  %v1044_v13 = vpop.f32.mrf.mxu0  ;;  %v1181_v11 = vpop.f32.mrf.mxu1 }
 0x19b   : > { %954 = vmatmul.f32.gmra.mxu3 %v2580_v56  ;;  %v1045_v14 = vadd.f32 %v1044_v13, %v2730_v4 }
 0x19d   : > { %v770_v17 = vpop.f32.mrf.mxu2  ;;  %v1182_v28 = vadd.f32 %v1181_v11, %v1045_v14  ;;  %1091 = vmatmul.f32.gmra.mxu0 %v2577_v55  ;;  %1228 = vmatmul.f32.gmra.mxu1 %v2580_v56 }
 0x19e   : > { %v907_v22 = vpop.f32.mrf.mxu3  ;;  %v771_v29 = vadd.f32 %v770_v17, %v2736_v42 }
 0x19f   : > { %1303 = vst [vmem:[%s2556_s15 + $0x40] sm:$0xff] %v1182_v28  ;;  %v1775_v28 = vld [vmem:[%s2262_s26 + $0x198] sm:$0xff] }
 0x1a0   : > { %v908_v59 = vadd.f32 %v907_v22, %v771_v29  ;;  %v1774_v22 = vld [vmem:[%s2262_s26 + $0x190] sm:$0xff] }
 0x1a2   : > { %1302 = vst [vmem:[%s2556_s15 + $0x38] sm:$0xff] %v908_v59  ;;  %820 = vmatmul.f32.gmra.mxu2 %v2591_v18  ;;  %v1047_v60 = vpop.f32.mrf.mxu0  ;;  %v1184_v23 = vpop.f32.mrf.mxu1 }
 0x1a3   : > { %957 = vmatmul.f32.gmra.mxu3 %v2594_v21  ;;  %v1048_v30 = vadd.f32 %v1047_v60, %v2730_v4 }
 0x1a5   : > { %v773_v55 = vpop.f32.mrf.mxu2  ;;  %v1185_v56 = vadd.f32 %v1184_v23, %v1048_v30  ;;  %1094 = vmatmul.f32.gmra.mxu0 %v2591_v18  ;;  %1231 = vmatmul.f32.gmra.mxu1 %v2594_v21 }
 0x1a6   : > { %v910_v19 = vpop.f32.mrf.mxu3  ;;  %v774_v20 = vadd.f32 %v773_v55, %v2736_v42 }
 0x1a7   : > { %1306 = vst [vmem:[%s2556_s15 + $0x58] sm:$0xff] %v1185_v56 }
 0x1a8   : > { %v911_v52 = vadd.f32 %v910_v19, %v774_v20  ;;  %v1776_v20 = vld [vmem:[%s2262_s26 + $0x1a0] sm:$0xff] }
 0x1aa   : > { %1305 = vst [vmem:[%s2556_s15 + $0x50] sm:$0xff] %v911_v52  ;;  %823 = vmatmul.f32.gmra.mxu2 %v1764_v53  ;;  %v1050_v7 = vpop.f32.mrf.mxu0  ;;  %v1187_v31 = vpop.f32.mrf.mxu1  ;;  %v1777_v52 = vld [vmem:[%s2262_s26 + $0x1a8] sm:$0xff] }
 0x1ab   : > { %960 = vmatmul.f32.gmra.mxu3 %v1765_v6  ;;  %v1051_v32 = vadd.f32 %v1050_v7, %v2730_v4 }
 0x1ad   : > { %v776_v18 = vpop.f32.mrf.mxu2  ;;  %v1188_v21 = vadd.f32 %v1187_v31, %v1051_v32  ;;  %1097 = vmatmul.f32.gmra.mxu0 %v1764_v53  ;;  %1234 = vmatmul.f32.gmra.mxu1 %v1765_v6 }
 0x1ae   : > { %v913_v39 = vpop.f32.mrf.mxu3  ;;  %v777_v40 = vadd.f32 %v776_v18, %v2736_v42 }
 0x1af   : > { %1309 = vst [vmem:[%s2556_s15 + $0x70] sm:$0xff] %v1188_v21 }
 0x1b0   : > { %v914_v26 = vadd.f32 %v913_v39, %v777_v40  ;;  %v1778_v40 = vld [vmem:[%s2262_s26 + $0x1b0] sm:$0xff] }
 0x1b2   : > { %1308 = vst [vmem:[%s2556_s15 + $0x68] sm:$0xff] %v914_v26  ;;  %826 = vmatmul.f32.gmra.mxu2 %v1766_v27  ;;  %v1053_v16 = vpop.f32.mrf.mxu0  ;;  %v1190_v41 = vpop.f32.mrf.mxu1  ;;  %v1779_v26 = vld [vmem:[%s2262_s26 + $0x1b8] sm:$0xff] }
 0x1b3   : > { %963 = vmatmul.f32.gmra.mxu3 %v1767_v15  ;;  %v1054_v44 = vadd.f32 %v1053_v16, %v2730_v4 }
 0x1b5   : > { %v779_v61 = vpop.f32.mrf.mxu2  ;;  %v1191_v45 = vadd.f32 %v1190_v41, %v1054_v44  ;;  %1100 = vmatmul.f32.gmra.mxu0 %v1766_v27  ;;  %1237 = vmatmul.f32.gmra.mxu1 %v1767_v15 }
 0x1b6   : > { %v916_v62 = vpop.f32.mrf.mxu3  ;;  %v780_v48 = vadd.f32 %v779_v61, %v2736_v42 }
 0x1b7   : > { %1312 = vst [vmem:[%s2556_s15 + $0x88] sm:$0xff] %v1191_v45 }
 0x1b8   : > { %v917_v24 = vadd.f32 %v916_v62, %v780_v48  ;;  %v1780_v48 = vld [vmem:[%s2262_s26 + $0x1c0] sm:$0xff] }
 0x1ba   : > { %1311 = vst [vmem:[%s2556_s15 + $0x80] sm:$0xff] %v917_v24  ;;  %829 = vmatmul.f32.gmra.mxu2 %v1768_v25  ;;  %v1056_v34 = vpop.f32.mrf.mxu0  ;;  %v1193_v49 = vpop.f32.mrf.mxu1  ;;  %v1781_v24 = vld [vmem:[%s2262_s26 + $0x1c8] sm:$0xff] }
 0x1bb   : > { %966 = vmatmul.f32.gmra.mxu3 %v1769_v33  ;;  %v1057_v57 = vadd.f32 %v1056_v34, %v2730_v4 }
 0x1bd   : > { %v782_v63 = vpop.f32.mrf.mxu2  ;;  %v1194_v35 = vadd.f32 %v1193_v49, %v1057_v57  ;;  %1103 = vmatmul.f32.gmra.mxu0 %v1768_v25  ;;  %1240 = vmatmul.f32.gmra.mxu1 %v1769_v33 }
 0x1be   : > { %v919_v0 = vpop.f32.mrf.mxu3  ;;  %v783_v38 = vadd.f32 %v782_v63, %v2736_v42 }
 0x1bf   : > { %1315 = vst [vmem:[%s2556_s15 + $0xa0] sm:$0xff] %v1194_v35 }
 0x1c0   : > { %v920_v5 = vadd.f32 %v919_v0, %v783_v38  ;;  %v1782_v38 = vld [vmem:[%s2262_s26 + $0x1d0] sm:$0xff] }
 0x1c2   : > { %1314 = vst [vmem:[%s2556_s15 + $0x98] sm:$0xff] %v920_v5  ;;  %832 = vmatmul.f32.gmra.mxu2 %v1770_v46  ;;  %v1059_v47 = vpop.f32.mrf.mxu0  ;;  %v1196_v58 = vpop.f32.mrf.mxu1  ;;  %v1783_v5 = vld [vmem:[%s2262_s26 + $0x1d8] sm:$0xff] }
 0x1c3   : > { %969 = vmatmul.f32.gmra.mxu3 %v1771_v43  ;;  %v1060_v3 = vadd.f32 %v1059_v47, %v2730_v4 }
 0x1c5   : > { %v785_v8 = vpop.f32.mrf.mxu2  ;;  %v1197_v10 = vadd.f32 %v1196_v58, %v1060_v3  ;;  %1106 = vmatmul.f32.gmra.mxu0 %v1770_v46  ;;  %1243 = vmatmul.f32.gmra.mxu1 %v1771_v43 }
 0x1c6   : > { %v922_v9 = vpop.f32.mrf.mxu3  ;;  %v786_v54 = vadd.f32 %v785_v8, %v2736_v42 }
 0x1c7   : > { %1318 = vst [vmem:[%s2556_s15 + $0xb8] sm:$0xff] %v1197_v10 }
 0x1c8   : > { %v923_v36 = vadd.f32 %v922_v9, %v786_v54  ;;  %v1784_v54 = vld [vmem:[%s2262_s26 + $0x1e0] sm:$0xff] }
 0x1ca   : > { %1317 = vst [vmem:[%s2556_s15 + $0xb0] sm:$0xff] %v923_v36  ;;  %835 = vmatmul.f32.gmra.mxu2 %v1772_v37  ;;  %v1062_v51 = vpop.f32.mrf.mxu0  ;;  %v1199_v1 = vpop.f32.mrf.mxu1  ;;  %v1785_v36 = vld [vmem:[%s2262_s26 + $0x1e8] sm:$0xff] }
 0x1cb   : > { %972 = vmatmul.f32.gmra.mxu3 %v1773_v50  ;;  %v1063_v2 = vadd.f32 %v1062_v51, %v2730_v4 }
 0x1cd   : > { %v788_v12 = vpop.f32.mrf.mxu2  ;;  %v1200_v11 = vadd.f32 %v1199_v1, %v1063_v2  ;;  %1109 = vmatmul.f32.gmra.mxu0 %v1772_v37  ;;  %1246 = vmatmul.f32.gmra.mxu1 %v1773_v50 }
 0x1ce   : > { %v925_v13 = vpop.f32.mrf.mxu3  ;;  %v789_v14 = vadd.f32 %v788_v12, %v2736_v42 }
 0x1cf   : > { %1321 = vst [vmem:[%s2556_s15 + $0xd0] sm:$0xff] %v1200_v11 }
 0x1d0   : > { %v926_v17 = vadd.f32 %v925_v13, %v789_v14  ;;  %v1786_v14 = vld [vmem:[%s2262_s26 + $0x1f0] sm:$0xff] }
 0x1d2   : > { %1320 = vst [vmem:[%s2556_s15 + $0xc8] sm:$0xff] %v926_v17  ;;  %838 = vmatmul.f32.gmra.mxu2 %v1774_v22  ;;  %v1065_v29 = vpop.f32.mrf.mxu0  ;;  %v1202_v59 = vpop.f32.mrf.mxu1  ;;  %v1787_v17 = vld [vmem:[%s2262_s26 + $0x1f8] sm:$0xff] }
 0x1d3   : > { %975 = vmatmul.f32.gmra.mxu3 %v1775_v28  ;;  %v1066_v60 = vadd.f32 %v1065_v29, %v2730_v4 }
 0x1d5   : > { %v791_v23 = vpop.f32.mrf.mxu2  ;;  %v1203_v55 = vadd.f32 %v1202_v59, %v1066_v60  ;;  %1112 = vmatmul.f32.gmra.mxu0 %v1774_v22  ;;  %1249 = vmatmul.f32.gmra.mxu1 %v1775_v28 }
 0x1d6   : > { %v928_v30 = vpop.f32.mrf.mxu3  ;;  %v792_v19 = vadd.f32 %v791_v23, %v2736_v42 }
 0x1d7   : > { %1324 = vst [vmem:[%s2556_s15 + $0xe8] sm:$0xff] %v1203_v55 }
 0x1d8   : > { %v929_v56 = vadd.f32 %v928_v30, %v792_v19  ;;  %v1788_v19 = vld [vmem:[%s2262_s26 + $0x200] sm:$0xff] }
 0x1da   : > { %1323 = vst [vmem:[%s2556_s15 + $0xe0] sm:$0xff] %v929_v56  ;;  %841 = vmatmul.f32.gmra.mxu2 %v1776_v20  ;;  %v1068_v53 = vpop.f32.mrf.mxu0  ;;  %v1205_v6 = vpop.f32.mrf.mxu1  ;;  %v1789_v56 = vld [vmem:[%s2262_s26 + $0x208] sm:$0xff] }
 0x1db   : > { %978 = vmatmul.f32.gmra.mxu3 %v1777_v52  ;;  %v1069_v7 = vadd.f32 %v1068_v53, %v2730_v4 }
 0x1dd   : > { %v794_v31 = vpop.f32.mrf.mxu2  ;;  %v1206_v18 = vadd.f32 %v1205_v6, %v1069_v7  ;;  %1115 = vmatmul.f32.gmra.mxu0 %v1776_v20  ;;  %1252 = vmatmul.f32.gmra.mxu1 %v1777_v52 }
 0x1de   : > { %v931_v32 = vpop.f32.mrf.mxu3  ;;  %v795_v39 = vadd.f32 %v794_v31, %v2736_v42 }
 0x1df   : > { %1327 = vst [vmem:[%s2556_s15 + $0x100] sm:$0xff] %v1206_v18 }
 0x1e0   : > { %v932_v21 = vadd.f32 %v931_v32, %v795_v39  ;;  %v1790_v39 = vld [vmem:[%s2262_s26 + $0x210] sm:$0xff] }
 0x1e2   : > { %1326 = vst [vmem:[%s2556_s15 + $0xf8] sm:$0xff] %v932_v21  ;;  %844 = vmatmul.f32.gmra.mxu2 %v1778_v40  ;;  %v1071_v27 = vpop.f32.mrf.mxu0  ;;  %v1208_v15 = vpop.f32.mrf.mxu1  ;;  %v1791_v21 = vld [vmem:[%s2262_s26 + $0x218] sm:$0xff] }
 0x1e3   : > { %981 = vmatmul.f32.gmra.mxu3 %v1779_v26  ;;  %v1072_v16 = vadd.f32 %v1071_v27, %v2730_v4 }
 0x1e5   : > { %v797_v41 = vpop.f32.mrf.mxu2  ;;  %v1209_v61 = vadd.f32 %v1208_v15, %v1072_v16  ;;  %1118 = vmatmul.f32.gmra.mxu0 %v1778_v40  ;;  %1255 = vmatmul.f32.gmra.mxu1 %v1779_v26 }
 0x1e6   : > { %v934_v44 = vpop.f32.mrf.mxu3  ;;  %v798_v62 = vadd.f32 %v797_v41, %v2736_v42 }
 0x1e7   : > { %1330 = vst [vmem:[%s2556_s15 + $0x118] sm:$0xff] %v1209_v61 }
 0x1e8   : > { %v935_v45 = vadd.f32 %v934_v44, %v798_v62  ;;  %v1792_v62 = vld [vmem:[%s2262_s26 + $0x220] sm:$0xff] }
 0x1ea   : > { %1329 = vst [vmem:[%s2556_s15 + $0x110] sm:$0xff] %v935_v45  ;;  %847 = vmatmul.f32.gmra.mxu2 %v1780_v48  ;;  %v1074_v25 = vpop.f32.mrf.mxu0  ;;  %v1211_v33 = vpop.f32.mrf.mxu1  ;;  %v1793_v45 = vld [vmem:[%s2262_s26 + $0x228] sm:$0xff] }
 0x1eb   : > { %984 = vmatmul.f32.gmra.mxu3 %v1781_v24  ;;  %v1075_v34 = vadd.f32 %v1074_v25, %v2730_v4 }
 0x1ed   : > { %v800_v49 = vpop.f32.mrf.mxu2  ;;  %v1212_v63 = vadd.f32 %v1211_v33, %v1075_v34  ;;  %1121 = vmatmul.f32.gmra.mxu0 %v1780_v48  ;;  %1258 = vmatmul.f32.gmra.mxu1 %v1781_v24 }
 0x1ee   : > { %v937_v57 = vpop.f32.mrf.mxu3  ;;  %v801_v0 = vadd.f32 %v800_v49, %v2736_v42 }
 0x1ef   : > { %1333 = vst [vmem:[%s2556_s15 + $0x130] sm:$0xff] %v1212_v63 }
 0x1f0   : > { %v938_v35 = vadd.f32 %v937_v57, %v801_v0  ;;  %v1794_v0 = vld [vmem:[%s2262_s26 + $0x230] sm:$0xff] }
 0x1f2   : > { %1332 = vst [vmem:[%s2556_s15 + $0x128] sm:$0xff] %v938_v35  ;;  %850 = vmatmul.f32.gmra.mxu2 %v1782_v38  ;;  %v1077_v46 = vpop.f32.mrf.mxu0  ;;  %v1214_v43 = vpop.f32.mrf.mxu1  ;;  %v1795_v35 = vld [vmem:[%s2262_s26 + $0x238] sm:$0xff] }
 0x1f3   : > { %987 = vmatmul.f32.gmra.mxu3 %v1783_v5  ;;  %v1078_v47 = vadd.f32 %v1077_v46, %v2730_v4 }
 0x1f5   : > { %v803_v58 = vpop.f32.mrf.mxu2  ;;  %v1215_v8 = vadd.f32 %v1214_v43, %v1078_v47  ;;  %1124 = vmatmul.f32.gmra.mxu0 %v1782_v38  ;;  %1261 = vmatmul.f32.gmra.mxu1 %v1783_v5 }
 0x1f6   : > { %v940_v3 = vpop.f32.mrf.mxu3  ;;  %v804_v9 = vadd.f32 %v803_v58, %v2736_v42 }
 0x1f7   : > { %1336 = vst [vmem:[%s2556_s15 + $0x148] sm:$0xff] %v1215_v8 }
 0x1f8   : > { %v941_v10 = vadd.f32 %v940_v3, %v804_v9  ;;  %v1796_v9 = vld [vmem:[%s2262_s26 + $0x240] sm:$0xff] }
 0x1fa   : > { %1335 = vst [vmem:[%s2556_s15 + $0x140] sm:$0xff] %v941_v10  ;;  %853 = vmatmul.f32.gmra.mxu2 %v1784_v54  ;;  %v1080_v37 = vpop.f32.mrf.mxu0  ;;  %v1217_v50 = vpop.f32.mrf.mxu1  ;;  %v1797_v10 = vld [vmem:[%s2262_s26 + $0x248] sm:$0xff] }
 0x1fb   : > { %990 = vmatmul.f32.gmra.mxu3 %v1785_v36  ;;  %v1081_v51 = vadd.f32 %v1080_v37, %v2730_v4 }
 0x1fd   : > { %v806_v1 = vpop.f32.mrf.mxu2  ;;  %v1218_v12 = vadd.f32 %v1217_v50, %v1081_v51  ;;  %1127 = vmatmul.f32.gmra.mxu0 %v1784_v54  ;;  %1264 = vmatmul.f32.gmra.mxu1 %v1785_v36 }
 0x1fe   : > { %v943_v2 = vpop.f32.mrf.mxu3  ;;  %v807_v13 = vadd.f32 %v806_v1, %v2736_v42 }
 0x1ff   : > { %1339 = vst [vmem:[%s2556_s15 + $0x160] sm:$0xff] %v1218_v12 }
 0x200   : > { %v944_v11 = vadd.f32 %v943_v2, %v807_v13  ;;  %v1798_v13 = vld [vmem:[%s2262_s26 + $0x250] sm:$0xff] }
 0x202   : > { %1338 = vst [vmem:[%s2556_s15 + $0x158] sm:$0xff] %v944_v11  ;;  %856 = vmatmul.f32.gmra.mxu2 %v1786_v14  ;;  %v1083_v22 = vpop.f32.mrf.mxu0  ;;  %v1220_v28 = vpop.f32.mrf.mxu1  ;;  %v1799_v11 = vld [vmem:[%s2262_s26 + $0x258] sm:$0xff] }
 0x203   : > { %993 = vmatmul.f32.gmra.mxu3 %v1787_v17  ;;  %v1084_v29 = vadd.f32 %v1083_v22, %v2730_v4 }
 0x205   : > { %v809_v59 = vpop.f32.mrf.mxu2  ;;  %v1221_v23 = vadd.f32 %v1220_v28, %v1084_v29  ;;  %1130 = vmatmul.f32.gmra.mxu0 %v1786_v14  ;;  %1267 = vmatmul.f32.gmra.mxu1 %v1787_v17 }
 0x206   : > { %v946_v60 = vpop.f32.mrf.mxu3  ;;  %v810_v30 = vadd.f32 %v809_v59, %v2736_v42 }
 0x207   : > { %1342 = vst [vmem:[%s2556_s15 + $0x178] sm:$0xff] %v1221_v23 }
 0x208   : > { %v947_v55 = vadd.f32 %v946_v60, %v810_v30  ;;  %v1800_v30 = vld [vmem:[%s2262_s26 + $0x260] sm:$0xff] }
 0x20a   : > { %1341 = vst [vmem:[%s2556_s15 + $0x170] sm:$0xff] %v947_v55  ;;  %859 = vmatmul.f32.gmra.mxu2 %v1788_v19  ;;  %v1086_v20 = vpop.f32.mrf.mxu0  ;;  %v1223_v52 = vpop.f32.mrf.mxu1  ;;  %v1801_v55 = vld [vmem:[%s2262_s26 + $0x268] sm:$0xff] }
 0x20b   : > { %996 = vmatmul.f32.gmra.mxu3 %v1789_v56  ;;  %v1087_v53 = vadd.f32 %v1086_v20, %v2730_v4 }
 0x20d   : > { %v812_v6 = vpop.f32.mrf.mxu2  ;;  %v1224_v31 = vadd.f32 %v1223_v52, %v1087_v53  ;;  %1133 = vmatmul.f32.gmra.mxu0 %v1788_v19  ;;  %1270 = vmatmul.f32.gmra.mxu1 %v1789_v56 }
 0x20e   : > { %v949_v7 = vpop.f32.mrf.mxu3  ;;  %v813_v32 = vadd.f32 %v812_v6, %v2736_v42 }
 0x20f   : > { %1345 = vst [vmem:[%s2556_s15 + $0x190] sm:$0xff] %v1224_v31 }
 0x210   : > { %v950_v18 = vadd.f32 %v949_v7, %v813_v32  ;;  %v1802_v32 = vld [vmem:[%s2262_s26 + $0x270] sm:$0xff] }
 0x212   : > { %1344 = vst [vmem:[%s2556_s15 + $0x188] sm:$0xff] %v950_v18  ;;  %862 = vmatmul.f32.gmra.mxu2 %v1790_v39  ;;  %v1089_v40 = vpop.f32.mrf.mxu0  ;;  %v1226_v26 = vpop.f32.mrf.mxu1  ;;  %v1803_v18 = vld [vmem:[%s2262_s26 + $0x278] sm:$0xff]  ;;  %s3067_s26 = smov %s3066_s21 }
 0x213   : > { %999 = vmatmul.f32.gmra.mxu3 %v1791_v21  ;;  %v1090_v27 = vadd.f32 %v1089_v40, %v2730_v4  ;;  %s1914_s6 = scalar_lea.hbm %s3067_s26, 3840  ;;  %p1915_p6 = scmp.lt.s32.totalorder %s1909_s28, %s3067_s26 }
 0x214   : > { %p1916_p7 = scmp.lt.s32.totalorder %s1914_s6, %s1910_s30 }
 0x215   : > { %v815_v15 = vpop.f32.mrf.mxu2  ;;  %v1227_v41 = vadd.f32 %v1226_v26, %v1090_v27  ;;  %1136 = vmatmul.f32.gmra.mxu0 %v1790_v39  ;;  %1273 = vmatmul.f32.gmra.mxu1 %v1791_v21 }
 0x216   : > { %v952_v16 = vpop.f32.mrf.mxu3  ;;  %v816_v44 = vadd.f32 %v815_v15, %v2736_v42  ;;  %p1917_p9 = por %p1916_p7, %p1915_p6 }
 0x217   : > { %1348 = vst [vmem:[%s2556_s15 + $0x1a8] sm:$0xff] %v1227_v41 }
 0x218   : > { %v953_v61 = vadd.f32 %v952_v16, %v816_v44  ;;  %p1918_p10 = pnand %p1917_p9, %p1913_p12 }
 0x21a   : > { %1347 = vst [vmem:[%s2556_s15 + $0x1a0] sm:$0xff] %v953_v61  ;;  %865 = vmatmul.f32.gmra.mxu2 %v1792_v62  ;;  %v1092_v48 = vpop.f32.mrf.mxu0  ;;  %v1229_v24 = vpop.f32.mrf.mxu1 }
 0x21b   : > { %1002 = vmatmul.f32.gmra.mxu3 %v1793_v45  ;;  %v1093_v25 = vadd.f32 %v1092_v48, %v2730_v4 }
 0x21d   : > { %v818_v33 = vpop.f32.mrf.mxu2  ;;  %v1230_v49 = vadd.f32 %v1229_v24, %v1093_v25  ;;  %1139 = vmatmul.f32.gmra.mxu0 %v1792_v62  ;;  %1276 = vmatmul.f32.gmra.mxu1 %v1793_v45 }
 0x21e   : > { %v955_v34 = vpop.f32.mrf.mxu3  ;;  %v819_v57 = vadd.f32 %v818_v33, %v2736_v42 }
 0x21f   : > { %1351 = vst [vmem:[%s2556_s15 + $0x1c0] sm:$0xff] %v1230_v49 }
 0x220   : > { %v956_v63 = vadd.f32 %v955_v34, %v819_v57 }
 0x222   : > { %1350 = vst [vmem:[%s2556_s15 + $0x1b8] sm:$0xff] %v956_v63  ;;  %868 = vmatmul.f32.gmra.mxu2 %v1794_v0  ;;  %v1095_v38 = vpop.f32.mrf.mxu0  ;;  %v1232_v5 = vpop.f32.mrf.mxu1 }
 0x223   : > { %1005 = vmatmul.f32.gmra.mxu3 %v1795_v35  ;;  %v1096_v46 = vadd.f32 %v1095_v38, %v2730_v4 }
 0x225   : > { %v821_v43 = vpop.f32.mrf.mxu2  ;;  %v1233_v58 = vadd.f32 %v1232_v5, %v1096_v46  ;;  %1142 = vmatmul.f32.gmra.mxu0 %v1794_v0  ;;  %1279 = vmatmul.f32.gmra.mxu1 %v1795_v35 }
 0x226   : > { %v958_v47 = vpop.f32.mrf.mxu3  ;;  %v822_v3 = vadd.f32 %v821_v43, %v2736_v42 }
 0x227   : > { %1354 = vst [vmem:[%s2556_s15 + $0x1d8] sm:$0xff] %v1233_v58 }
 0x228   : > { %v959_v8 = vadd.f32 %v958_v47, %v822_v3 }
 0x22a   : > { %1353 = vst [vmem:[%s2556_s15 + $0x1d0] sm:$0xff] %v959_v8  ;;  %871 = vmatmul.f32.gmra.mxu2 %v1796_v9  ;;  %v1098_v54 = vpop.f32.mrf.mxu0  ;;  %v1235_v36 = vpop.f32.mrf.mxu1 }
 0x22b   : > { %1008 = vmatmul.f32.gmra.mxu3 %v1797_v10  ;;  %v1099_v37 = vadd.f32 %v1098_v54, %v2730_v4 }
 0x22d   : > { %v824_v50 = vpop.f32.mrf.mxu2  ;;  %v1236_v1 = vadd.f32 %v1235_v36, %v1099_v37  ;;  %1145 = vmatmul.f32.gmra.mxu0 %v1796_v9  ;;  %1282 = vmatmul.f32.gmra.mxu1 %v1797_v10 }
 0x22e   : > { %v961_v51 = vpop.f32.mrf.mxu3  ;;  %v825_v2 = vadd.f32 %v824_v50, %v2736_v42 }
 0x22f   : > { %1357 = vst [vmem:[%s2556_s15 + $0x1f0] sm:$0xff] %v1236_v1 }
 0x230   : > { %v962_v12 = vadd.f32 %v961_v51, %v825_v2 }
 0x232   : > { %1356 = vst [vmem:[%s2556_s15 + $0x1e8] sm:$0xff] %v962_v12  ;;  %874 = vmatmul.f32.gmra.mxu2 %v1798_v13  ;;  %v1101_v14 = vpop.f32.mrf.mxu0  ;;  %v1238_v17 = vpop.f32.mrf.mxu1 }
 0x233   : > { %1011 = vmatmul.f32.gmra.mxu3 %v1799_v11  ;;  %v1102_v22 = vadd.f32 %v1101_v14, %v2730_v4 }
 0x235   : > { %v827_v28 = vpop.f32.mrf.mxu2  ;;  %v1239_v59 = vadd.f32 %v1238_v17, %v1102_v22  ;;  %1148 = vmatmul.f32.gmra.mxu0 %v1798_v13  ;;  %1285 = vmatmul.f32.gmra.mxu1 %v1799_v11 }
 0x236   : > { %v964_v29 = vpop.f32.mrf.mxu3  ;;  %v828_v60 = vadd.f32 %v827_v28, %v2736_v42 }
 0x237   : > { %1360 = vst [vmem:[%s2556_s15 + $0x208] sm:$0xff] %v1239_v59 }
 0x238   : > { %v965_v23 = vadd.f32 %v964_v29, %v828_v60 }
 0x23a   : > { %1359 = vst [vmem:[%s2556_s15 + $0x200] sm:$0xff] %v965_v23  ;;  %877 = vmatmul.f32.gmra.mxu2 %v1800_v30  ;;  %v1104_v19 = vpop.f32.mrf.mxu0  ;;  %v1241_v56 = vpop.f32.mrf.mxu1 }
 0x23b   : > { %1014 = vmatmul.f32.gmra.mxu3 %v1801_v55  ;;  %v1105_v20 = vadd.f32 %v1104_v19, %v2730_v4 }
 0x23d   : > { %v830_v52 = vpop.f32.mrf.mxu2  ;;  %v1242_v6 = vadd.f32 %v1241_v56, %v1105_v20  ;;  %1151 = vmatmul.f32.gmra.mxu0 %v1800_v30  ;;  %1288 = vmatmul.f32.gmra.mxu1 %v1801_v55 }
 0x23e   : > { %v967_v53 = vpop.f32.mrf.mxu3  ;;  %v831_v7 = vadd.f32 %v830_v52, %v2736_v42 }
 0x23f   : > { %1363 = vst [vmem:[%s2556_s15 + $0x220] sm:$0xff] %v1242_v6 }
 0x240   : > { %v968_v31 = vadd.f32 %v967_v53, %v831_v7 }
 0x242   : > { %1362 = vst [vmem:[%s2556_s15 + $0x218] sm:$0xff] %v968_v31  ;;  %880 = vmatmul.f32.gmra.mxu2 %v1802_v32  ;;  %v1107_v39 = vpop.f32.mrf.mxu0  ;;  %v1244_v21 = vpop.f32.mrf.mxu1 }
 0x243   : > { %1017 = vmatmul.f32.gmra.mxu3 %v1803_v18  ;;  %v1108_v40 = vadd.f32 %v1107_v39, %v2730_v4 }
 0x245   : > { %v833_v26 = vpop.f32.mrf.mxu2  ;;  %v1245_v15 = vadd.f32 %v1244_v21, %v1108_v40  ;;  %1154 = vmatmul.f32.gmra.mxu0 %v1802_v32  ;;  %1291 = vmatmul.f32.gmra.mxu1 %v1803_v18 }
 0x246   : > { %v970_v27 = vpop.f32.mrf.mxu3  ;;  %v834_v16 = vadd.f32 %v833_v26, %v2736_v42 }
 0x247   : > { %1366 = vst [vmem:[%s2556_s15 + $0x238] sm:$0xff] %v1245_v15 }
 0x248   : > { %v971_v41 = vadd.f32 %v970_v27, %v834_v16 }
 0x24a   : > { %1365 = vst [vmem:[%s2556_s15 + $0x230] sm:$0xff] %v971_v41  ;;  %v1110_v44 = vpop.f32.mrf.mxu0  ;;  %v1247_v61 = vpop.f32.mrf.mxu1 }
 0x24b   : > { %v1111_v62 = vadd.f32 %v1110_v44, %v2730_v4 }
 0x24d   : > { %v836_v45 = vpop.f32.mrf.mxu2  ;;  %v1248_v24 = vadd.f32 %v1247_v61, %v1111_v62 }
 0x24e   : > { %v973_v48 = vpop.f32.mrf.mxu3  ;;  %v837_v25 = vadd.f32 %v836_v45, %v2736_v42 }
 0x24f   : > { %1369 = vst [vmem:[%s2556_s15 + $0x250] sm:$0xff] %v1248_v24 }
 0x250   : > { %v974_v33 = vadd.f32 %v973_v48, %v837_v25 }
 0x252   : > { %1368 = vst [vmem:[%s2556_s15 + $0x248] sm:$0xff] %v974_v33  ;;  %v1113_v34 = vpop.f32.mrf.mxu0  ;;  %v1250_v49 = vpop.f32.mrf.mxu1 }
 0x253   : > { %v1114_v57 = vadd.f32 %v1113_v34, %v2730_v4 }
 0x255   : > { %v839_v63 = vpop.f32.mrf.mxu2  ;;  %v1251_v35 = vadd.f32 %v1250_v49, %v1114_v57 }
 0x256   : > { %v976_v0 = vpop.f32.mrf.mxu3  ;;  %v840_v38 = vadd.f32 %v839_v63, %v2736_v42 }
 0x257   : > { %1372 = vst [vmem:[%s2556_s15 + $0x268] sm:$0xff] %v1251_v35 }
 0x258   : > { %v977_v5 = vadd.f32 %v976_v0, %v840_v38 }
 0x25a   : > { %1371 = vst [vmem:[%s2556_s15 + $0x260] sm:$0xff] %v977_v5  ;;  %v1116_v46 = vpop.f32.mrf.mxu0  ;;  %v1253_v43 = vpop.f32.mrf.mxu1 }
 0x25b   : > { %v1117_v47 = vadd.f32 %v1116_v46, %v2730_v4 }
 0x25d   : > { %v842_v58 = vpop.f32.mrf.mxu2  ;;  %v1254_v8 = vadd.f32 %v1253_v43, %v1117_v47 }
 0x25e   : > { %v979_v3 = vpop.f32.mrf.mxu3  ;;  %v843_v9 = vadd.f32 %v842_v58, %v2736_v42 }
 0x25f   : > { %1375 = vst [vmem:[%s2556_s15 + $0x280] sm:$0xff] %v1254_v8 }
 0x260   : > { %v980_v10 = vadd.f32 %v979_v3, %v843_v9 }
 0x262   : > { %1374 = vst [vmem:[%s2556_s15 + $0x278] sm:$0xff] %v980_v10  ;;  %v1119_v54 = vpop.f32.mrf.mxu0  ;;  %v1256_v36 = vpop.f32.mrf.mxu1 }
 0x263   : > { %v1120_v37 = vadd.f32 %v1119_v54, %v2730_v4 }
 0x265   : > { %v845_v50 = vpop.f32.mrf.mxu2  ;;  %v1257_v1 = vadd.f32 %v1256_v36, %v1120_v37 }
 0x266   : > { %v982_v51 = vpop.f32.mrf.mxu3  ;;  %v846_v2 = vadd.f32 %v845_v50, %v2736_v42 }
 0x267   : > { %1378 = vst [vmem:[%s2556_s15 + $0x298] sm:$0xff] %v1257_v1 }
 0x268   : > { %v983_v12 = vadd.f32 %v982_v51, %v846_v2 }
 0x26a   : > { %1377 = vst [vmem:[%s2556_s15 + $0x290] sm:$0xff] %v983_v12  ;;  %v1122_v13 = vpop.f32.mrf.mxu0  ;;  %v1259_v11 = vpop.f32.mrf.mxu1 }
 0x26b   : > { %v1123_v14 = vadd.f32 %v1122_v13, %v2730_v4 }
 0x26d   : > { %v848_v17 = vpop.f32.mrf.mxu2  ;;  %v1260_v28 = vadd.f32 %v1259_v11, %v1123_v14 }
 0x26e   : > { %v985_v22 = vpop.f32.mrf.mxu3  ;;  %v849_v29 = vadd.f32 %v848_v17, %v2736_v42 }
 0x26f   : > { %1381 = vst [vmem:[%s2556_s15 + $0x2b0] sm:$0xff] %v1260_v28 }
 0x270   : > { %v986_v59 = vadd.f32 %v985_v22, %v849_v29 }
 0x272   : > { %1380 = vst [vmem:[%s2556_s15 + $0x2a8] sm:$0xff] %v986_v59  ;;  %v1125_v60 = vpop.f32.mrf.mxu0  ;;  %v1262_v23 = vpop.f32.mrf.mxu1 }
 0x273   : > { %v1126_v30 = vadd.f32 %v1125_v60, %v2730_v4 }
 0x275   : > { %v851_v55 = vpop.f32.mrf.mxu2  ;;  %v1263_v56 = vadd.f32 %v1262_v23, %v1126_v30 }
 0x276   : > { %v988_v19 = vpop.f32.mrf.mxu3  ;;  %v852_v20 = vadd.f32 %v851_v55, %v2736_v42 }
 0x277   : > { %1384 = vst [vmem:[%s2556_s15 + $0x2c8] sm:$0xff] %v1263_v56 }
 0x278   : > { %v989_v52 = vadd.f32 %v988_v19, %v852_v20 }
 0x27a   : > { %1383 = vst [vmem:[%s2556_s15 + $0x2c0] sm:$0xff] %v989_v52  ;;  %v1128_v53 = vpop.f32.mrf.mxu0  ;;  %v1265_v6 = vpop.f32.mrf.mxu1 }
 0x27b   : > { %v1129_v7 = vadd.f32 %v1128_v53, %v2730_v4 }
 0x27d   : > { %v854_v31 = vpop.f32.mrf.mxu2  ;;  %v1266_v18 = vadd.f32 %v1265_v6, %v1129_v7 }
 0x27e   : > { %v991_v32 = vpop.f32.mrf.mxu3  ;;  %v855_v39 = vadd.f32 %v854_v31, %v2736_v42 }
 0x27f   : > { %1387 = vst [vmem:[%s2556_s15 + $0x2e0] sm:$0xff] %v1266_v18 }
 0x280   : > { %v992_v21 = vadd.f32 %v991_v32, %v855_v39 }
 0x282   : > { %1386 = vst [vmem:[%s2556_s15 + $0x2d8] sm:$0xff] %v992_v21  ;;  %v1131_v40 = vpop.f32.mrf.mxu0  ;;  %v1268_v26 = vpop.f32.mrf.mxu1 }
 0x283   : > { %v1132_v27 = vadd.f32 %v1131_v40, %v2730_v4 }
 0x285   : > { %v857_v15 = vpop.f32.mrf.mxu2  ;;  %v1269_v41 = vadd.f32 %v1268_v26, %v1132_v27 }
 0x286   : > { %v994_v16 = vpop.f32.mrf.mxu3  ;;  %v858_v44 = vadd.f32 %v857_v15, %v2736_v42 }
 0x287   : > { %1390 = vst [vmem:[%s2556_s15 + $0x2f8] sm:$0xff] %v1269_v41 }
 0x288   : > { %v995_v61 = vadd.f32 %v994_v16, %v858_v44 }
 0x28a   : > { %1389 = vst [vmem:[%s2556_s15 + $0x2f0] sm:$0xff] %v995_v61  ;;  %v1134_v62 = vpop.f32.mrf.mxu0  ;;  %v1271_v45 = vpop.f32.mrf.mxu1 }
 0x28b   : > { %v1135_v48 = vadd.f32 %v1134_v62, %v2730_v4 }
 0x28d   : > { %v860_v24 = vpop.f32.mrf.mxu2  ;;  %v1272_v33 = vadd.f32 %v1271_v45, %v1135_v48 }
 0x28e   : > { %v997_v25 = vpop.f32.mrf.mxu3  ;;  %v861_v34 = vadd.f32 %v860_v24, %v2736_v42 }
 0x28f   : > { %1393 = vst [vmem:[%s2556_s15 + $0x310] sm:$0xff] %v1272_v33 }
 0x290   : > { %v998_v49 = vadd.f32 %v997_v25, %v861_v34 }
 0x292   : > { %1392 = vst [vmem:[%s2556_s15 + $0x308] sm:$0xff] %v998_v49  ;;  %v1137_v57 = vpop.f32.mrf.mxu0  ;;  %v1274_v63 = vpop.f32.mrf.mxu1 }
 0x293   : > { %v1138_v0 = vadd.f32 %v1137_v57, %v2730_v4 }
 0x295   : > { %v863_v35 = vpop.f32.mrf.mxu2  ;;  %v1275_v5 = vadd.f32 %v1274_v63, %v1138_v0 }
 0x296   : > { %v1000_v38 = vpop.f32.mrf.mxu3  ;;  %v864_v46 = vadd.f32 %v863_v35, %v2736_v42 }
 0x297   : > { %1396 = vst [vmem:[%s2556_s15 + $0x328] sm:$0xff] %v1275_v5 }
 0x298   : > { %v1001_v43 = vadd.f32 %v1000_v38, %v864_v46 }
 0x29a   : > { %1395 = vst [vmem:[%s2556_s15 + $0x320] sm:$0xff] %v1001_v43  ;;  %v1140_v47 = vpop.f32.mrf.mxu0  ;;  %v1277_v58 = vpop.f32.mrf.mxu1 }
 0x29b   : > { %v1141_v3 = vadd.f32 %v1140_v47, %v2730_v4 }
 0x29d   : > { %v866_v8 = vpop.f32.mrf.mxu2  ;;  %v1278_v10 = vadd.f32 %v1277_v58, %v1141_v3 }
 0x29e   : > { %v1003_v9 = vpop.f32.mrf.mxu3  ;;  %v867_v54 = vadd.f32 %v866_v8, %v2736_v42 }
 0x29f   : > { %1399 = vst [vmem:[%s2556_s15 + $0x340] sm:$0xff] %v1278_v10 }
 0x2a0   : > { %v1004_v36 = vadd.f32 %v1003_v9, %v867_v54 }
 0x2a2   : > { %1398 = vst [vmem:[%s2556_s15 + $0x338] sm:$0xff] %v1004_v36  ;;  %v1143_v37 = vpop.f32.mrf.mxu0  ;;  %v1280_v50 = vpop.f32.mrf.mxu1 }
 0x2a3   : > { %v1144_v51 = vadd.f32 %v1143_v37, %v2730_v4 }
 0x2a5   : > { %v869_v1 = vpop.f32.mrf.mxu2  ;;  %v1281_v12 = vadd.f32 %v1280_v50, %v1144_v51 }
 0x2a6   : > { %v1006_v2 = vpop.f32.mrf.mxu3  ;;  %v870_v13 = vadd.f32 %v869_v1, %v2736_v42 }
 0x2a7   : > { %1402 = vst [vmem:[%s2556_s15 + $0x358] sm:$0xff] %v1281_v12 }
 0x2a8   : > { %v1007_v11 = vadd.f32 %v1006_v2, %v870_v13 }
 0x2aa   : > { %1401 = vst [vmem:[%s2556_s15 + $0x350] sm:$0xff] %v1007_v11  ;;  %v1146_v14 = vpop.f32.mrf.mxu0  ;;  %v1283_v17 = vpop.f32.mrf.mxu1 }
 0x2ab   : > { %v1147_v22 = vadd.f32 %v1146_v14, %v2730_v4 }
 0x2ad   : > { %v872_v28 = vpop.f32.mrf.mxu2  ;;  %v1284_v59 = vadd.f32 %v1283_v17, %v1147_v22 }
 0x2ae   : > { %v1009_v29 = vpop.f32.mrf.mxu3  ;;  %v873_v60 = vadd.f32 %v872_v28, %v2736_v42 }
 0x2af   : > { %1405 = vst [vmem:[%s2556_s15 + $0x370] sm:$0xff] %v1284_v59 }
 0x2b0   : > { %v1010_v23 = vadd.f32 %v1009_v29, %v873_v60 }
 0x2b2   : > { %1404 = vst [vmem:[%s2556_s15 + $0x368] sm:$0xff] %v1010_v23  ;;  %v1149_v30 = vpop.f32.mrf.mxu0  ;;  %v1286_v55 = vpop.f32.mrf.mxu1 }
 0x2b3   : > { %v1150_v19 = vadd.f32 %v1149_v30, %v2730_v4 }
 0x2b5   : > { %v875_v56 = vpop.f32.mrf.mxu2  ;;  %v1287_v52 = vadd.f32 %v1286_v55, %v1150_v19 }
 0x2b6   : > { %v1012_v20 = vpop.f32.mrf.mxu3  ;;  %v876_v53 = vadd.f32 %v875_v56, %v2736_v42 }
 0x2b7   : > { %1408 = vst [vmem:[%s2556_s15 + $0x388] sm:$0xff] %v1287_v52 }
 0x2b8   : > { %v1013_v6 = vadd.f32 %v1012_v20, %v876_v53 }
 0x2ba   : > { %1407 = vst [vmem:[%s2556_s15 + $0x380] sm:$0xff] %v1013_v6  ;;  %v1152_v7 = vpop.f32.mrf.mxu0  ;;  %v1289_v31 = vpop.f32.mrf.mxu1 }
 0x2bb   : > { %v1153_v32 = vadd.f32 %v1152_v7, %v2730_v4 }
 0x2bd   : > { %v878_v18 = vpop.f32.mrf.mxu2  ;;  %v1290_v21 = vadd.f32 %v1289_v31, %v1153_v32 }
 0x2be   : > { %v1015_v39 = vpop.f32.mrf.mxu3  ;;  %v879_v40 = vadd.f32 %v878_v18, %v2736_v42 }
 0x2bf   : > { %1411 = vst [vmem:[%s2556_s15 + $0x3a0] sm:$0xff] %v1290_v21 }
 0x2c0   : > { %v1016_v26 = vadd.f32 %v1015_v39, %v879_v40 }
 0x2c2   : > { %1410 = vst [vmem:[%s2556_s15 + $0x398] sm:$0xff] %v1016_v26  ;;  %v1155_v27 = vpop.f32.mrf.mxu0  ;;  %v1292_v15 = vpop.f32.mrf.mxu1 }
 0x2c3   : > { %v1156_v16 = vadd.f32 %v1155_v27, %v2730_v4 }
 0x2c5   : > { %v881_v41 = vpop.f32.mrf.mxu2  ;;  %v1293_v61 = vadd.f32 %v1292_v15, %v1156_v16 }
 0x2c6   : > { %v1018_v44 = vpop.f32.mrf.mxu3  ;;  %v882_v62 = vadd.f32 %v881_v41, %v2736_v42 }
 0x2c7   : > { %1414 = vst [vmem:[%s2556_s15 + $0x3b8] sm:$0xff] %v1293_v61 }
 0x2c8   : > { %v1019_v45 = vadd.f32 %v1018_v44, %v882_v62 }
 0x2ca   : > { %1413 = vst [vmem:[%s2556_s15 + $0x3b0] sm:$0xff] %v1019_v45 }
 0x2cb   : > { %1921 = shalt.err (!%p1918_p10)
}
 0x2cc   : > { %s2051_s7 = smov 384   ;;  %s2052_s15 = smov 768  }
 0x2cd   : > { %s2053_s3 = smov 24  }
 0x2ce   : > { %1625 = dma.vmem_to_hbm [thread:$0]  (%p2233_p3), %s1432_s14, 15360, %s1434_s20, %s1416_s22, %s2051_s7, %s2052_s15, %s2053_s3  }
 0x2cf PF: > { %s3069_s27 = sld [smem:[#allocation12_spill]]  ;;  %p1643_p13 = scmp.ge.s32.totalorder %s2044_s25, 2 }
 0x2d1   : > { %p1638_p11 = pnand %p1643_p13, %p2237_p2 }
 0x2d3   : > { %p1639_p1 = pneg %p1638_p11 }
 0x2d5   : > { %s1448_s5 = sand.u32 1, %s3069_s27  }
 0x2d6   : > { %s1449_s10 = scalar_lea.sflag [#allocation4], %s1448_s5 }
 0x2d7   : > { %1987 = dma.done.wait (%p1639_p1), %s1449_s10, 15360  }
 0x2d8   : > { %1989 = vsyncadd (%p1639_p1), %s1449_s10, 4294951936  ;;  %s22_s25 = sadd.s32 1, %s2044_s25   ;;  %s3072_s8 = sld [smem:[#allocation13_spill]] }
 0x2d9   : > { %p2975_p4 = scmp.ge.s32.totalorder %s22_s25, 6   ;;  %s3073_s14 = sld [smem:[#allocation22_spill]] }
 0x2da   : > { %s3074_s21 = sld [smem:[#allocation21_spill]]  ;;  %s3080_s12 = smov %s1996_s13 }
 0x2db   : > { %s3075_s23 = sld [smem:[#allocation14_spill]]  ;;  %s3082_s15 = smov %s2008_s16 }
 0x2dc   : > { %s3076_s20 = sld [smem:[#allocation20_spill]]  ;;  %s3083_s16 = smov %s2012_s17 }
 0x2dd   : > { %s3077_s22 = sld [smem:[#allocation17_spill]]  ;;  %s3085_s18 = smov %s2020_s19 }
 0x2de   : > { %s3078_s28 = sld [smem:[#allocation18_spill]]  ;;  %s3081_s13 = smov %s3072_s8 }
 0x2df   : > { %s3079_s30 = sld [smem:[#allocation19_spill]] }
 0x2e0   : > { %s3084_s17 = smov %s3074_s21 }
 0x2e1   : > { %s3086_s19 = smov %s3075_s23  ;;  %21 = sbr.rel (!%p2975_p4) target bundleno = 15 (0xf), region = 101 }
 0x2e3   : > { %s3087_s21 = smov %s3077_s22  ;;  %s3088_s22 = smov %s2040_s24 }
 0x2e4   : > { %s3089_s23 = smov %s3078_s28 }
 0x2e5   : > { %s3090_s24 = smov %s3079_s30 }
 0x2e6   :  { %1455 = vsyncpa [#allocation3], 1 }
 0x2e7   :  { %1457 = vsyncpa [#allocation3 + $0x1], 1 }
 0x2e8   :  { %1458 = vsyncpa [#allocation6], 1 }
 0x2e9   :  { %1460 = vsyncpa [#allocation6 + $0x1], 1 }
 0x2ea   :  { %1461 = vsyncpa [#allocation4], 1 }
 0x2eb   :  { %1463 = vsyncpa [#allocation4 + $0x1], 1 }

</bundles_post_ra>
